<compile_context>
chip_gen: v7x
topology: tpu7x:2x2x1
jax: 0.10.0
libtpu: 0.0.40
codegen_flags: <defaults>
</compile_context>

<pallas_src>
import functools

import numpy as np
import jax
import jax.numpy as jnp
from jax.experimental import pallas as pl
from jax.experimental.pallas import tpu as pltpu

K_SIZE, STRIDE, PAD = 3, 2, 1
CHANNELS = 32
BN_EPS = 1e-5
HEAD_WIDTH = 128          # lane-dense combined actor|critic output width

_VMEM = pl.BlockSpec(memory_space=pltpu.MemorySpace.VMEM)


# ---------------------------------------------------------------------------
# Fused Pallas kernel: conv1..conv4 (+BN+ReLU) + linear0 + actor/critic head
# ---------------------------------------------------------------------------
def _bn_relu(y, s_ref):
    # s_ref: (2, C) f32 -> row 0 = gamma, row 1 = beta.
    gamma = s_ref[0:1, :]
    beta = s_ref[1:2, :]
    # BatchNorm2d training-mode forward: per-channel batch stats over all
    # (N, H, W) rows, biased variance, eps=1e-5 (matches PyTorch).
    mean = jnp.mean(y, axis=0, keepdims=True)
    var = jnp.mean((y - mean) ** 2, axis=0, keepdims=True)
    y = (y - mean) * jax.lax.rsqrt(var + BN_EPS)
    return jnp.maximum(y * gamma + beta, 0.0)


def _fused_kernel(p1_ref, w1_ref, s1_ref,
                  g2_ref, w2_ref, s2_ref,
                  g3_ref, w3_ref, s3_ref,
                  g4_ref, w4_ref, s4_ref,
                  w0_ref, b0_ref, wh_ref, bh_ref,
                  out_ref, *, num_actions):
    # ---- layer 1: conv as one matmul on wrapper-built im2col patches -------
    y = jnp.dot(p1_ref[...], w1_ref[...], preferred_element_type=jnp.float32)
    y = _bn_relu(y, s1_ref)

    # ---- layers 2..4: in-VMEM im2col via one-hot tap gathers on the MXU ----
    for g_ref, w_ref, s_ref in ((g2_ref, w2_ref, s2_ref),
                                (g3_ref, w3_ref, s3_ref),
                                (g4_ref, w4_ref, s4_ref)):
        yb = y.astype(jnp.bfloat16)            # MXU inputs in bf16
        w_all = w_ref[...]                     # (9*C, C) bf16, rows (kh,kw,cin)
        rows = g_ref.shape[1]
        acc = jnp.zeros((rows, CHANNELS), jnp.float32)
        for t in range(K_SIZE * K_SIZE):
            # one-hot gather: picks the (n, 2*oh+kh-1, 2*ow+kw-1) input rows,
            # zero rows where the tap lands in the zero padding.
            sel = jnp.dot(g_ref[t], yb, preferred_element_type=jnp.float32)
            acc = acc + jnp.dot(sel.astype(jnp.bfloat16),
                                w_all[t * CHANNELS:(t + 1) * CHANNELS, :],
                                preferred_element_type=jnp.float32)
        y = _bn_relu(acc, s_ref)

    # ---- FC head: linear0 + ReLU, merged actor|critic matmul ---------------
    h = jnp.dot(y.astype(jnp.bfloat16), w0_ref[...],
                preferred_element_type=jnp.float32) + b0_ref[...]
    h = jnp.maximum(h, 0.0)
    comb = jnp.dot(h.astype(jnp.bfloat16), wh_ref[...],
                   preferred_element_type=jnp.float32) + bh_ref[...]

    # softmax over the first `num_actions` lanes only; lane `num_actions`
    # carries the raw critic value and passes through untouched.
    lane = jax.lax.broadcasted_iota(jnp.int32, comb.shape, 1)
    is_action = lane < num_actions
    logits = jnp.where(is_action, comb, jnp.float32(-1e30))
    m = jnp.max(logits, axis=-1, keepdims=True)
    e = jnp.exp(logits - m)
    denom = jnp.sum(e, axis=-1, keepdims=True)
    probs = e * pl.reciprocal(denom, approx=True)
    out_ref[...] = jnp.where(is_action, probs, comb)


def fused_forward(*args, batch, num_actions):
    kernel = functools.partial(_fused_kernel, num_actions=num_actions)
    return pl.pallas_call(
        kernel,
        out_shape=jax.ShapeDtypeStruct((batch, HEAD_WIDTH), jnp.float32),
        in_specs=[_VMEM] * len(args),
        out_specs=_VMEM,
    )(*args)


# ---------------------------------------------------------------------------
# Wrapper-side glue (runs once per jit trace / fused into the XLA graph)
# ---------------------------------------------------------------------------
def im2col(x, k=K_SIZE, s=STRIDE, p=PAD):
    # x: (N, H, W, C) -> patches (N*OH*OW, k*k*C), rows ordered (n, oh, ow),
    # columns ordered (kh, kw, cin).  Used for the *input* layer only.
    N, H, W, C = x.shape
    OH = (H + 2 * p - k) // s + 1
    OW = (W + 2 * p - k) // s + 1
    xp = jnp.pad(x, ((0, 0), (p, p), (p, p), (0, 0)))
    cols = []
    for i in range(k):
        for j in range(k):
            cols.append(xp[:, i:i + s * (OH - 1) + 1:s,
                           j:j + s * (OW - 1) + 1:s, :])
    patches = jnp.concatenate(cols, axis=-1)
    return patches.reshape(N * OH * OW, k * k * C), (N, OH, OW)


def build_gather_matrices(batch, h, w):
    # One 0/1 gather matrix per 3x3 tap for a stride-2, pad-1 conv whose input
    # activation is stored as rows (n, ih, iw).  Built with numpy at trace
    # time; zero rows implement the zero padding.
    oh = (h + 2 * PAD - K_SIZE) // STRIDE + 1
    ow = (w + 2 * PAD - K_SIZE) // STRIDE + 1
    g = np.zeros((K_SIZE * K_SIZE, batch * oh * ow, batch * h * w), np.float32)
    for di in range(K_SIZE):
        for dj in range(K_SIZE):
            t = di * K_SIZE + dj
            for n in range(batch):
                for r in range(oh):
                    for c in range(ow):
                        ih = STRIDE * r + di - PAD
                        iw = STRIDE * c + dj - PAD
                        if 0 <= ih < h and 0 <= iw < w:
                            g[t, n * oh * ow + r * ow + c,
                              n * h * w + ih * w + iw] = 1.0
    return jnp.asarray(g, dtype=jnp.bfloat16), (oh, ow)


# ---------------------------------------------------------------------------
# Deterministic synthetic parameters (shapes from Actor_Critic.__init__)
# ---------------------------------------------------------------------------
def init_params(key, in_channels, h, w, num_actions):
    keys = jax.random.split(key, 7)
    convs = []
    cin = in_channels
    for l in range(4):
        fan_in = cin * K_SIZE * K_SIZE
        bound = float(np.sqrt(6.0 / fan_in))        # kaiming_uniform-style
        w_mat = jax.random.uniform(keys[l], (K_SIZE * K_SIZE * cin, CHANNELS),
                                   jnp.float32, -bound, bound)
        # Conv bias omitted: it is cancelled by training-mode BatchNorm (and
        # PyTorch init sets it to zero anyway).
        convs.append(dict(
            w=w_mat,                                         # rows (kh,kw,cin)
            gamma=jnp.ones((1, CHANNELS), jnp.float32),      # BN weight
            beta=jnp.zeros((1, CHANNELS), jnp.float32),      # BN bias
        ))
        cin = CHANNELS

    oh, ow = h, w
    for _ in range(4):
        oh = (oh + 2 * PAD - K_SIZE) // STRIDE + 1
        ow = (ow + 2 * PAD - K_SIZE) // STRIDE + 1
    fc_in = CHANNELS * oh * ow                       # == _get_conv_output_dim

    def lin(k, fi, fo):
        bound = float(np.sqrt(6.0 / fi))
        return jax.random.uniform(k, (fi, fo), jnp.float32, -bound, bound)

    params = dict(
        convs=convs,
        w0=lin(keys[4], fc_in, 200), b0=jnp.zeros((1, 200), jnp.float32),
        wa=lin(keys[5], 200, num_actions),
        ba=jnp.zeros((1, num_actions), jnp.float32),
        wc=lin(keys[6], 200, 1), bc=jnp.zeros((1, 1), jnp.float32),
    )
    return params, fc_in, (oh, ow)


# ---------------------------------------------------------------------------
# Forward pass (== Actor_Critic.forward)
# ---------------------------------------------------------------------------
def actor_critic_forward(params, x_nchw):
    x = jnp.transpose(x_nchw, (0, 2, 3, 1)).astype(jnp.float32)  # NCHW -> NHWC
    N = x.shape[0]
    A = params["wa"].shape[1]
    assert A + 1 <= HEAD_WIDTH

    # Layer-1 im2col is input-side preprocessing; pad its contraction dim to a
    # multiple of 8 (36 -> 40) with zero columns / zero weight rows.
    patches1, (_, oh, ow) = im2col(x)
    k1 = patches1.shape[1]
    k1p = -(-k1 // 8) * 8
    patches1 = jnp.pad(patches1, ((0, 0), (0, k1p - k1))).astype(jnp.bfloat16)
    w1 = jnp.pad(params["convs"][0]["w"],
                 ((0, k1p - k1), (0, 0))).astype(jnp.bfloat16)

    # One-hot tap gather matrices for layers 2..4 (trace-time constants).
    gathers = []
    hh, ww = oh, ow
    for _ in range(3):
        g, (hh, ww) = build_gather_matrices(N, hh, ww)
        gathers.append(g)
    # TODO(synk): the fused head assumes the final conv spatial size is 1x1
    # (true for 16x16 inputs); generalize the flatten order for larger inputs.
    assert hh == 1 and ww == 1

    def bn(l):
        return jnp.concatenate([params["convs"][l]["gamma"],
                                params["convs"][l]["beta"]], axis=0)

    # Merge actor|critic into one lane-dense (200, 128) weight / (1, 128) bias.
    wa, ba, wc, bc = params["wa"], params["ba"], params["wc"], params["bc"]
    whead = jnp.zeros((wa.shape[0], HEAD_WIDTH), jnp.float32)
    whead = whead.at[:, :A].set(wa).at[:, A:A + 1].set(wc)
    bhead = jnp.zeros((1, HEAD_WIDTH), jnp.float32)
    bhead = bhead.at[:, :A].set(ba).at[:, A:A + 1].set(bc)

    args = [patches1, w1, bn(0)]
    for l in range(1, 4):
        args += [gathers[l - 1],
                 params["convs"][l]["w"].astype(jnp.bfloat16),
                 bn(l)]
    args += [params["w0"].astype(jnp.bfloat16), params["b0"],
             whead.astype(jnp.bfloat16), bhead]

    out = fused_forward(*args, batch=N, num_actions=A)
    probs = out[:, :A]
    value = out[:, A:A + 1]
    return probs, value


if __name__ == "__main__":
    key = jax.random.PRNGKey(0)
    k_param, k_x = jax.random.split(key)

    obs_dim = (4, 16, 16)          # (C, H, W) like the PyTorch module
    num_actions = 6                # Pong action space
    batch = 2

    params, fc_in, final_hw = init_params(k_param, *obs_dim, num_actions)
    x = jax.random.normal(k_x, (batch,) + obs_dim, jnp.float32)   # NCHW input

    probs, value = jax.jit(actor_critic_forward)(params, x)
    jax.block_until_ready((probs, value))

    assert probs.shape == (batch, num_actions)
    assert value.shape == (batch, 1)
    # approx-reciprocal softmax: rows sum to 1 within the EUP approx error.
    assert bool(jnp.allclose(jnp.sum(probs, axis=-1), 1.0, atol=2e-3))
    assert bool(jnp.all(jnp.isfinite(value)))
    print("KERNEL_OK")
</pallas_src>

<mosaic_0001>
module attributes {stable_mosaic.version = 11 : i64} {
  func.func @_fused_kernel(%arg0: memref<128x40xbf16, #tpu.memory_space<vmem>>, %arg1: memref<40x32xbf16, #tpu.memory_space<vmem>>, %arg2: memref<2x32xf32, #tpu.memory_space<vmem>>, %arg3: memref<9x32x128xbf16, #tpu.memory_space<vmem>>, %arg4: memref<288x32xbf16, #tpu.memory_space<vmem>>, %arg5: memref<2x32xf32, #tpu.memory_space<vmem>>, %arg6: memref<9x8x32xbf16, #tpu.memory_space<vmem>>, %arg7: memref<288x32xbf16, #tpu.memory_space<vmem>>, %arg8: memref<2x32xf32, #tpu.memory_space<vmem>>, %arg9: memref<9x2x8xbf16, #tpu.memory_space<vmem>>, %arg10: memref<288x32xbf16, #tpu.memory_space<vmem>>, %arg11: memref<2x32xf32, #tpu.memory_space<vmem>>, %arg12: memref<32x200xbf16, #tpu.memory_space<vmem>>, %arg13: memref<1x200xf32, #tpu.memory_space<vmem>>, %arg14: memref<200x128xbf16, #tpu.memory_space<vmem>>, %arg15: memref<1x128xf32, #tpu.memory_space<vmem>>, %arg16: memref<2x128xf32, #tpu.memory_space<vmem>>) attributes {dimension_semantics = [], scalar_prefetch = 0 : i64, scratch_operands = 0 : i64, tpu.core_type = #tpu.core_type<tc>} {
    %c0 = arith.constant 0 : index
    %c0_0 = arith.constant 0 : index
    %0 = vector.load %arg0[%c0, %c0_0] : memref<128x40xbf16, #tpu.memory_space<vmem>>, vector<128x40xbf16>
    %c0_1 = arith.constant 0 : index
    %c0_2 = arith.constant 0 : index
    %1 = vector.load %arg1[%c0_1, %c0_2] : memref<40x32xbf16, #tpu.memory_space<vmem>>, vector<40x32xbf16>
    %cst = arith.constant dense<0.000000e+00> : vector<128x32xf32>
    %2 = tpu.matmul %0, %1, %cst {dimension_numbers = #tpu.dot_dimension_numbers<[1], [0], [0], [1], [0, 0, 1, 1], [], []>} : vector<128x40xbf16>, vector<40x32xbf16>, vector<128x32xf32> -> vector<128x32xf32>
    %c0_3 = arith.constant 0 : index
    %c0_4 = arith.constant 0 : index
    %3 = vector.load %arg2[%c0_3, %c0_4] : memref<2x32xf32, #tpu.memory_space<vmem>>, vector<1x32xf32>
    %c1 = arith.constant 1 : index
    %c0_5 = arith.constant 0 : index
    %4 = vector.load %arg2[%c1, %c0_5] : memref<2x32xf32, #tpu.memory_space<vmem>>, vector<1x32xf32>
    %cst_6 = arith.constant dense<0.000000e+00> : vector<32xf32>
    %5 = vector.multi_reduction <add>, %2, %cst_6 [0] : vector<128x32xf32> to vector<32xf32>
    %6 = vector.shape_cast %5 : vector<32xf32> to vector<1x32xf32>
    %cst_7 = arith.constant 1.280000e+02 : f32
    %7 = vector.broadcast %cst_7 : f32 to vector<1x32xf32>
    %8 = arith.divf %6, %7 : vector<1x32xf32>
    %9 = vector.broadcast %8 : vector<1x32xf32> to vector<128x32xf32>
    %10 = arith.subf %2, %9 : vector<128x32xf32>
    %11 = arith.mulf %10, %10 : vector<128x32xf32>
    %cst_8 = arith.constant dense<0.000000e+00> : vector<32xf32>
    %12 = vector.multi_reduction <add>, %11, %cst_8 [0] : vector<128x32xf32> to vector<32xf32>
    %13 = vector.shape_cast %12 : vector<32xf32> to vector<1x32xf32>
    %cst_9 = arith.constant 1.280000e+02 : f32
    %14 = vector.broadcast %cst_9 : f32 to vector<1x32xf32>
    %15 = arith.divf %13, %14 : vector<1x32xf32>
    %16 = vector.broadcast %8 : vector<1x32xf32> to vector<128x32xf32>
    %17 = arith.subf %2, %16 : vector<128x32xf32>
    %cst_10 = arith.constant 9.99999974E-6 : f32
    %18 = vector.broadcast %cst_10 : f32 to vector<1x32xf32>
    %19 = arith.addf %15, %18 : vector<1x32xf32>
    %20 = math.rsqrt %19 : vector<1x32xf32>
    %21 = vector.broadcast %20 : vector<1x32xf32> to vector<128x32xf32>
    %22 = arith.mulf %17, %21 : vector<128x32xf32>
    %23 = vector.broadcast %3 : vector<1x32xf32> to vector<128x32xf32>
    %24 = arith.mulf %22, %23 : vector<128x32xf32>
    %25 = vector.broadcast %4 : vector<1x32xf32> to vector<128x32xf32>
    %26 = arith.addf %24, %25 : vector<128x32xf32>
    %cst_11 = arith.constant 0.000000e+00 : f32
    %27 = vector.broadcast %cst_11 : f32 to vector<128x32xf32>
    %28 = arith.maximumf %26, %27 : vector<128x32xf32>
    %29 = arith.truncf %28 : vector<128x32xf32> to vector<128x32xbf16>
    %c0_12 = arith.constant 0 : index
    %c0_13 = arith.constant 0 : index
    %30 = vector.load %arg4[%c0_12, %c0_13] : memref<288x32xbf16, #tpu.memory_space<vmem>>, vector<288x32xbf16>
    %cst_14 = arith.constant 0.000000e+00 : f32
    %31 = vector.broadcast %cst_14 : f32 to vector<32x32xf32>
    %c0_15 = arith.constant 0 : index
    %c0_16 = arith.constant 0 : index
    %c0_17 = arith.constant 0 : index
    %32 = vector.load %arg3[%c0_15, %c0_16, %c0_17] : memref<9x32x128xbf16, #tpu.memory_space<vmem>>, vector<1x32x128xbf16>
    %33 = vector.shape_cast %32 : vector<1x32x128xbf16> to vector<32x128xbf16>
    %cst_18 = arith.constant dense<0.000000e+00> : vector<32x32xf32>
    %34 = tpu.matmul %33, %29, %cst_18 {dimension_numbers = #tpu.dot_dimension_numbers<[1], [0], [0], [1], [0, 0, 1, 1], [], []>} : vector<32x128xbf16>, vector<128x32xbf16>, vector<32x32xf32> -> vector<32x32xf32>
    %35 = arith.truncf %34 : vector<32x32xf32> to vector<32x32xbf16>
    %36 = vector.extract_strided_slice %30 {offsets = [0, 0], sizes = [32, 32], strides = [1, 1]} : vector<288x32xbf16> to vector<32x32xbf16>
    %cst_19 = arith.constant dense<0.000000e+00> : vector<32x32xf32>
    %37 = tpu.matmul %35, %36, %cst_19 {dimension_numbers = #tpu.dot_dimension_numbers<[1], [0], [0], [1], [0, 0, 1, 1], [], []>} : vector<32x32xbf16>, vector<32x32xbf16>, vector<32x32xf32> -> vector<32x32xf32>
    %38 = arith.addf %31, %37 : vector<32x32xf32>
    %c1_20 = arith.constant 1 : index
    %c0_21 = arith.constant 0 : index
    %c0_22 = arith.constant 0 : index
    %39 = vector.load %arg3[%c1_20, %c0_21, %c0_22] : memref<9x32x128xbf16, #tpu.memory_space<vmem>>, vector<1x32x128xbf16>
    %40 = vector.shape_cast %39 : vector<1x32x128xbf16> to vector<32x128xbf16>
    %cst_23 = arith.constant dense<0.000000e+00> : vector<32x32xf32>
    %41 = tpu.matmul %40, %29, %cst_23 {dimension_numbers = #tpu.dot_dimension_numbers<[1], [0], [0], [1], [0, 0, 1, 1], [], []>} : vector<32x128xbf16>, vector<128x32xbf16>, vector<32x32xf32> -> vector<32x32xf32>
    %42 = arith.truncf %41 : vector<32x32xf32> to vector<32x32xbf16>
    %43 = vector.extract_strided_slice %30 {offsets = [32, 0], sizes = [32, 32], strides = [1, 1]} : vector<288x32xbf16> to vector<32x32xbf16>
    %cst_24 = arith.constant dense<0.000000e+00> : vector<32x32xf32>
    %44 = tpu.matmul %42, %43, %cst_24 {dimension_numbers = #tpu.dot_dimension_numbers<[1], [0], [0], [1], [0, 0, 1, 1], [], []>} : vector<32x32xbf16>, vector<32x32xbf16>, vector<32x32xf32> -> vector<32x32xf32>
    %45 = arith.addf %38, %44 : vector<32x32xf32>
    %c2 = arith.constant 2 : index
    %c0_25 = arith.constant 0 : index
    %c0_26 = arith.constant 0 : index
    %46 = vector.load %arg3[%c2, %c0_25, %c0_26] : memref<9x32x128xbf16, #tpu.memory_space<vmem>>, vector<1x32x128xbf16>
    %47 = vector.shape_cast %46 : vector<1x32x128xbf16> to vector<32x128xbf16>
    %cst_27 = arith.constant dense<0.000000e+00> : vector<32x32xf32>
    %48 = tpu.matmul %47, %29, %cst_27 {dimension_numbers = #tpu.dot_dimension_numbers<[1], [0], [0], [1], [0, 0, 1, 1], [], []>} : vector<32x128xbf16>, vector<128x32xbf16>, vector<32x32xf32> -> vector<32x32xf32>
    %49 = arith.truncf %48 : vector<32x32xf32> to vector<32x32xbf16>
    %50 = vector.extract_strided_slice %30 {offsets = [64, 0], sizes = [32, 32], strides = [1, 1]} : vector<288x32xbf16> to vector<32x32xbf16>
    %cst_28 = arith.constant dense<0.000000e+00> : vector<32x32xf32>
    %51 = tpu.matmul %49, %50, %cst_28 {dimension_numbers = #tpu.dot_dimension_numbers<[1], [0], [0], [1], [0, 0, 1, 1], [], []>} : vector<32x32xbf16>, vector<32x32xbf16>, vector<32x32xf32> -> vector<32x32xf32>
    %52 = arith.addf %45, %51 : vector<32x32xf32>
    %c3 = arith.constant 3 : index
    %c0_29 = arith.constant 0 : index
    %c0_30 = arith.constant 0 : index
    %53 = vector.load %arg3[%c3, %c0_29, %c0_30] : memref<9x32x128xbf16, #tpu.memory_space<vmem>>, vector<1x32x128xbf16>
    %54 = vector.shape_cast %53 : vector<1x32x128xbf16> to vector<32x128xbf16>
    %cst_31 = arith.constant dense<0.000000e+00> : vector<32x32xf32>
    %55 = tpu.matmul %54, %29, %cst_31 {dimension_numbers = #tpu.dot_dimension_numbers<[1], [0], [0], [1], [0, 0, 1, 1], [], []>} : vector<32x128xbf16>, vector<128x32xbf16>, vector<32x32xf32> -> vector<32x32xf32>
    %56 = arith.truncf %55 : vector<32x32xf32> to vector<32x32xbf16>
    %57 = vector.extract_strided_slice %30 {offsets = [96, 0], sizes = [32, 32], strides = [1, 1]} : vector<288x32xbf16> to vector<32x32xbf16>
    %cst_32 = arith.constant dense<0.000000e+00> : vector<32x32xf32>
    %58 = tpu.matmul %56, %57, %cst_32 {dimension_numbers = #tpu.dot_dimension_numbers<[1], [0], [0], [1], [0, 0, 1, 1], [], []>} : vector<32x32xbf16>, vector<32x32xbf16>, vector<32x32xf32> -> vector<32x32xf32>
    %59 = arith.addf %52, %58 : vector<32x32xf32>
    %c4 = arith.constant 4 : index
    %c0_33 = arith.constant 0 : index
    %c0_34 = arith.constant 0 : index
    %60 = vector.load %arg3[%c4, %c0_33, %c0_34] : memref<9x32x128xbf16, #tpu.memory_space<vmem>>, vector<1x32x128xbf16>
    %61 = vector.shape_cast %60 : vector<1x32x128xbf16> to vector<32x128xbf16>
    %cst_35 = arith.constant dense<0.000000e+00> : vector<32x32xf32>
    %62 = tpu.matmul %61, %29, %cst_35 {dimension_numbers = #tpu.dot_dimension_numbers<[1], [0], [0], [1], [0, 0, 1, 1], [], []>} : vector<32x128xbf16>, vector<128x32xbf16>, vector<32x32xf32> -> vector<32x32xf32>
    %63 = arith.truncf %62 : vector<32x32xf32> to vector<32x32xbf16>
    %64 = vector.extract_strided_slice %30 {offsets = [128, 0], sizes = [32, 32], strides = [1, 1]} : vector<288x32xbf16> to vector<32x32xbf16>
    %cst_36 = arith.constant dense<0.000000e+00> : vector<32x32xf32>
    %65 = tpu.matmul %63, %64, %cst_36 {dimension_numbers = #tpu.dot_dimension_numbers<[1], [0], [0], [1], [0, 0, 1, 1], [], []>} : vector<32x32xbf16>, vector<32x32xbf16>, vector<32x32xf32> -> vector<32x32xf32>
    %66 = arith.addf %59, %65 : vector<32x32xf32>
    %c5 = arith.constant 5 : index
    %c0_37 = arith.constant 0 : index
    %c0_38 = arith.constant 0 : index
    %67 = vector.load %arg3[%c5, %c0_37, %c0_38] : memref<9x32x128xbf16, #tpu.memory_space<vmem>>, vector<1x32x128xbf16>
    %68 = vector.shape_cast %67 : vector<1x32x128xbf16> to vector<32x128xbf16>
    %cst_39 = arith.constant dense<0.000000e+00> : vector<32x32xf32>
    %69 = tpu.matmul %68, %29, %cst_39 {dimension_numbers = #tpu.dot_dimension_numbers<[1], [0], [0], [1], [0, 0, 1, 1], [], []>} : vector<32x128xbf16>, vector<128x32xbf16>, vector<32x32xf32> -> vector<32x32xf32>
    %70 = arith.truncf %69 : vector<32x32xf32> to vector<32x32xbf16>
    %71 = vector.extract_strided_slice %30 {offsets = [160, 0], sizes = [32, 32], strides = [1, 1]} : vector<288x32xbf16> to vector<32x32xbf16>
    %cst_40 = arith.constant dense<0.000000e+00> : vector<32x32xf32>
    %72 = tpu.matmul %70, %71, %cst_40 {dimension_numbers = #tpu.dot_dimension_numbers<[1], [0], [0], [1], [0, 0, 1, 1], [], []>} : vector<32x32xbf16>, vector<32x32xbf16>, vector<32x32xf32> -> vector<32x32xf32>
    %73 = arith.addf %66, %72 : vector<32x32xf32>
    %c6 = arith.constant 6 : index
    %c0_41 = arith.constant 0 : index
    %c0_42 = arith.constant 0 : index
    %74 = vector.load %arg3[%c6, %c0_41, %c0_42] : memref<9x32x128xbf16, #tpu.memory_space<vmem>>, vector<1x32x128xbf16>
    %75 = vector.shape_cast %74 : vector<1x32x128xbf16> to vector<32x128xbf16>
    %cst_43 = arith.constant dense<0.000000e+00> : vector<32x32xf32>
    %76 = tpu.matmul %75, %29, %cst_43 {dimension_numbers = #tpu.dot_dimension_numbers<[1], [0], [0], [1], [0, 0, 1, 1], [], []>} : vector<32x128xbf16>, vector<128x32xbf16>, vector<32x32xf32> -> vector<32x32xf32>
    %77 = arith.truncf %76 : vector<32x32xf32> to vector<32x32xbf16>
    %78 = vector.extract_strided_slice %30 {offsets = [192, 0], sizes = [32, 32], strides = [1, 1]} : vector<288x32xbf16> to vector<32x32xbf16>
    %cst_44 = arith.constant dense<0.000000e+00> : vector<32x32xf32>
    %79 = tpu.matmul %77, %78, %cst_44 {dimension_numbers = #tpu.dot_dimension_numbers<[1], [0], [0], [1], [0, 0, 1, 1], [], []>} : vector<32x32xbf16>, vector<32x32xbf16>, vector<32x32xf32> -> vector<32x32xf32>
    %80 = arith.addf %73, %79 : vector<32x32xf32>
    %c7 = arith.constant 7 : index
    %c0_45 = arith.constant 0 : index
    %c0_46 = arith.constant 0 : index
    %81 = vector.load %arg3[%c7, %c0_45, %c0_46] : memref<9x32x128xbf16, #tpu.memory_space<vmem>>, vector<1x32x128xbf16>
    %82 = vector.shape_cast %81 : vector<1x32x128xbf16> to vector<32x128xbf16>
    %cst_47 = arith.constant dense<0.000000e+00> : vector<32x32xf32>
    %83 = tpu.matmul %82, %29, %cst_47 {dimension_numbers = #tpu.dot_dimension_numbers<[1], [0], [0], [1], [0, 0, 1, 1], [], []>} : vector<32x128xbf16>, vector<128x32xbf16>, vector<32x32xf32> -> vector<32x32xf32>
    %84 = arith.truncf %83 : vector<32x32xf32> to vector<32x32xbf16>
    %85 = vector.extract_strided_slice %30 {offsets = [224, 0], sizes = [32, 32], strides = [1, 1]} : vector<288x32xbf16> to vector<32x32xbf16>
    %cst_48 = arith.constant dense<0.000000e+00> : vector<32x32xf32>
    %86 = tpu.matmul %84, %85, %cst_48 {dimension_numbers = #tpu.dot_dimension_numbers<[1], [0], [0], [1], [0, 0, 1, 1], [], []>} : vector<32x32xbf16>, vector<32x32xbf16>, vector<32x32xf32> -> vector<32x32xf32>
    %87 = arith.addf %80, %86 : vector<32x32xf32>
    %c8 = arith.constant 8 : index
    %c0_49 = arith.constant 0 : index
    %c0_50 = arith.constant 0 : index
    %88 = vector.load %arg3[%c8, %c0_49, %c0_50] : memref<9x32x128xbf16, #tpu.memory_space<vmem>>, vector<1x32x128xbf16>
    %89 = vector.shape_cast %88 : vector<1x32x128xbf16> to vector<32x128xbf16>
    %cst_51 = arith.constant dense<0.000000e+00> : vector<32x32xf32>
    %90 = tpu.matmul %89, %29, %cst_51 {dimension_numbers = #tpu.dot_dimension_numbers<[1], [0], [0], [1], [0, 0, 1, 1], [], []>} : vector<32x128xbf16>, vector<128x32xbf16>, vector<32x32xf32> -> vector<32x32xf32>
    %91 = arith.truncf %90 : vector<32x32xf32> to vector<32x32xbf16>
    %92 = vector.extract_strided_slice %30 {offsets = [256, 0], sizes = [32, 32], strides = [1, 1]} : vector<288x32xbf16> to vector<32x32xbf16>
    %cst_52 = arith.constant dense<0.000000e+00> : vector<32x32xf32>
    %93 = tpu.matmul %91, %92, %cst_52 {dimension_numbers = #tpu.dot_dimension_numbers<[1], [0], [0], [1], [0, 0, 1, 1], [], []>} : vector<32x32xbf16>, vector<32x32xbf16>, vector<32x32xf32> -> vector<32x32xf32>
    %94 = arith.addf %87, %93 : vector<32x32xf32>
    %c0_53 = arith.constant 0 : index
    %c0_54 = arith.constant 0 : index
    %95 = vector.load %arg5[%c0_53, %c0_54] : memref<2x32xf32, #tpu.memory_space<vmem>>, vector<1x32xf32>
    %c1_55 = arith.constant 1 : index
    %c0_56 = arith.constant 0 : index
    %96 = vector.load %arg5[%c1_55, %c0_56] : memref<2x32xf32, #tpu.memory_space<vmem>>, vector<1x32xf32>
    %cst_57 = arith.constant dense<0.000000e+00> : vector<32xf32>
    %97 = vector.multi_reduction <add>, %94, %cst_57 [0] : vector<32x32xf32> to vector<32xf32>
    %98 = vector.shape_cast %97 : vector<32xf32> to vector<1x32xf32>
    %cst_58 = arith.constant 3.200000e+01 : f32
    %99 = vector.broadcast %cst_58 : f32 to vector<1x32xf32>
    %100 = arith.divf %98, %99 : vector<1x32xf32>
    %101 = vector.broadcast %100 : vector<1x32xf32> to vector<32x32xf32>
    %102 = arith.subf %94, %101 : vector<32x32xf32>
    %103 = arith.mulf %102, %102 : vector<32x32xf32>
    %cst_59 = arith.constant dense<0.000000e+00> : vector<32xf32>
    %104 = vector.multi_reduction <add>, %103, %cst_59 [0] : vector<32x32xf32> to vector<32xf32>
    %105 = vector.shape_cast %104 : vector<32xf32> to vector<1x32xf32>
    %cst_60 = arith.constant 3.200000e+01 : f32
    %106 = vector.broadcast %cst_60 : f32 to vector<1x32xf32>
    %107 = arith.divf %105, %106 : vector<1x32xf32>
    %108 = vector.broadcast %100 : vector<1x32xf32> to vector<32x32xf32>
    %109 = arith.subf %94, %108 : vector<32x32xf32>
    %cst_61 = arith.constant 9.99999974E-6 : f32
    %110 = vector.broadcast %cst_61 : f32 to vector<1x32xf32>
    %111 = arith.addf %107, %110 : vector<1x32xf32>
    %112 = math.rsqrt %111 : vector<1x32xf32>
    %113 = vector.broadcast %112 : vector<1x32xf32> to vector<32x32xf32>
    %114 = arith.mulf %109, %113 : vector<32x32xf32>
    %115 = vector.broadcast %95 : vector<1x32xf32> to vector<32x32xf32>
    %116 = arith.mulf %114, %115 : vector<32x32xf32>
    %117 = vector.broadcast %96 : vector<1x32xf32> to vector<32x32xf32>
    %118 = arith.addf %116, %117 : vector<32x32xf32>
    %cst_62 = arith.constant 0.000000e+00 : f32
    %119 = vector.broadcast %cst_62 : f32 to vector<32x32xf32>
    %120 = arith.maximumf %118, %119 : vector<32x32xf32>
    %121 = arith.truncf %120 : vector<32x32xf32> to vector<32x32xbf16>
    %c0_63 = arith.constant 0 : index
    %c0_64 = arith.constant 0 : index
    %122 = vector.load %arg7[%c0_63, %c0_64] : memref<288x32xbf16, #tpu.memory_space<vmem>>, vector<288x32xbf16>
    %cst_65 = arith.constant 0.000000e+00 : f32
    %123 = vector.broadcast %cst_65 : f32 to vector<8x32xf32>
    %c0_66 = arith.constant 0 : index
    %c0_67 = arith.constant 0 : index
    %c0_68 = arith.constant 0 : index
    %124 = vector.load %arg6[%c0_66, %c0_67, %c0_68] : memref<9x8x32xbf16, #tpu.memory_space<vmem>>, vector<1x8x32xbf16>
    %125 = vector.shape_cast %124 : vector<1x8x32xbf16> to vector<8x32xbf16>
    %cst_69 = arith.constant dense<0.000000e+00> : vector<8x32xf32>
    %126 = tpu.matmul %125, %121, %cst_69 {dimension_numbers = #tpu.dot_dimension_numbers<[1], [0], [0], [1], [0, 0, 1, 1], [], []>} : vector<8x32xbf16>, vector<32x32xbf16>, vector<8x32xf32> -> vector<8x32xf32>
    %127 = arith.truncf %126 : vector<8x32xf32> to vector<8x32xbf16>
    %128 = vector.extract_strided_slice %122 {offsets = [0, 0], sizes = [32, 32], strides = [1, 1]} : vector<288x32xbf16> to vector<32x32xbf16>
    %cst_70 = arith.constant dense<0.000000e+00> : vector<8x32xf32>
    %129 = tpu.matmul %127, %128, %cst_70 {dimension_numbers = #tpu.dot_dimension_numbers<[1], [0], [0], [1], [0, 0, 1, 1], [], []>} : vector<8x32xbf16>, vector<32x32xbf16>, vector<8x32xf32> -> vector<8x32xf32>
    %130 = arith.addf %123, %129 : vector<8x32xf32>
    %c1_71 = arith.constant 1 : index
    %c0_72 = arith.constant 0 : index
    %c0_73 = arith.constant 0 : index
    %131 = vector.load %arg6[%c1_71, %c0_72, %c0_73] : memref<9x8x32xbf16, #tpu.memory_space<vmem>>, vector<1x8x32xbf16>
    %132 = vector.shape_cast %131 : vector<1x8x32xbf16> to vector<8x32xbf16>
    %cst_74 = arith.constant dense<0.000000e+00> : vector<8x32xf32>
    %133 = tpu.matmul %132, %121, %cst_74 {dimension_numbers = #tpu.dot_dimension_numbers<[1], [0], [0], [1], [0, 0, 1, 1], [], []>} : vector<8x32xbf16>, vector<32x32xbf16>, vector<8x32xf32> -> vector<8x32xf32>
    %134 = arith.truncf %133 : vector<8x32xf32> to vector<8x32xbf16>
    %135 = vector.extract_strided_slice %122 {offsets = [32, 0], sizes = [32, 32], strides = [1, 1]} : vector<288x32xbf16> to vector<32x32xbf16>
    %cst_75 = arith.constant dense<0.000000e+00> : vector<8x32xf32>
    %136 = tpu.matmul %134, %135, %cst_75 {dimension_numbers = #tpu.dot_dimension_numbers<[1], [0], [0], [1], [0, 0, 1, 1], [], []>} : vector<8x32xbf16>, vector<32x32xbf16>, vector<8x32xf32> -> vector<8x32xf32>
    %137 = arith.addf %130, %136 : vector<8x32xf32>
    %c2_76 = arith.constant 2 : index
    %c0_77 = arith.constant 0 : index
    %c0_78 = arith.constant 0 : index
    %138 = vector.load %arg6[%c2_76, %c0_77, %c0_78] : memref<9x8x32xbf16, #tpu.memory_space<vmem>>, vector<1x8x32xbf16>
    %139 = vector.shape_cast %138 : vector<1x8x32xbf16> to vector<8x32xbf16>
    %cst_79 = arith.constant dense<0.000000e+00> : vector<8x32xf32>
    %140 = tpu.matmul %139, %121, %cst_79 {dimension_numbers = #tpu.dot_dimension_numbers<[1], [0], [0], [1], [0, 0, 1, 1], [], []>} : vector<8x32xbf16>, vector<32x32xbf16>, vector<8x32xf32> -> vector<8x32xf32>
    %141 = arith.truncf %140 : vector<8x32xf32> to vector<8x32xbf16>
    %142 = vector.extract_strided_slice %122 {offsets = [64, 0], sizes = [32, 32], strides = [1, 1]} : vector<288x32xbf16> to vector<32x32xbf16>
    %cst_80 = arith.constant dense<0.000000e+00> : vector<8x32xf32>
    %143 = tpu.matmul %141, %142, %cst_80 {dimension_numbers = #tpu.dot_dimension_numbers<[1], [0], [0], [1], [0, 0, 1, 1], [], []>} : vector<8x32xbf16>, vector<32x32xbf16>, vector<8x32xf32> -> vector<8x32xf32>
    %144 = arith.addf %137, %143 : vector<8x32xf32>
    %c3_81 = arith.constant 3 : index
    %c0_82 = arith.constant 0 : index
    %c0_83 = arith.constant 0 : index
    %145 = vector.load %arg6[%c3_81, %c0_82, %c0_83] : memref<9x8x32xbf16, #tpu.memory_space<vmem>>, vector<1x8x32xbf16>
    %146 = vector.shape_cast %145 : vector<1x8x32xbf16> to vector<8x32xbf16>
    %cst_84 = arith.constant dense<0.000000e+00> : vector<8x32xf32>
    %147 = tpu.matmul %146, %121, %cst_84 {dimension_numbers = #tpu.dot_dimension_numbers<[1], [0], [0], [1], [0, 0, 1, 1], [], []>} : vector<8x32xbf16>, vector<32x32xbf16>, vector<8x32xf32> -> vector<8x32xf32>
    %148 = arith.truncf %147 : vector<8x32xf32> to vector<8x32xbf16>
    %149 = vector.extract_strided_slice %122 {offsets = [96, 0], sizes = [32, 32], strides = [1, 1]} : vector<288x32xbf16> to vector<32x32xbf16>
    %cst_85 = arith.constant dense<0.000000e+00> : vector<8x32xf32>
    %150 = tpu.matmul %148, %149, %cst_85 {dimension_numbers = #tpu.dot_dimension_numbers<[1], [0], [0], [1], [0, 0, 1, 1], [], []>} : vector<8x32xbf16>, vector<32x32xbf16>, vector<8x32xf32> -> vector<8x32xf32>
    %151 = arith.addf %144, %150 : vector<8x32xf32>
    %c4_86 = arith.constant 4 : index
    %c0_87 = arith.constant 0 : index
    %c0_88 = arith.constant 0 : index
    %152 = vector.load %arg6[%c4_86, %c0_87, %c0_88] : memref<9x8x32xbf16, #tpu.memory_space<vmem>>, vector<1x8x32xbf16>
    %153 = vector.shape_cast %152 : vector<1x8x32xbf16> to vector<8x32xbf16>
    %cst_89 = arith.constant dense<0.000000e+00> : vector<8x32xf32>
    %154 = tpu.matmul %153, %121, %cst_89 {dimension_numbers = #tpu.dot_dimension_numbers<[1], [0], [0], [1], [0, 0, 1, 1], [], []>} : vector<8x32xbf16>, vector<32x32xbf16>, vector<8x32xf32> -> vector<8x32xf32>
    %155 = arith.truncf %154 : vector<8x32xf32> to vector<8x32xbf16>
    %156 = vector.extract_strided_slice %122 {offsets = [128, 0], sizes = [32, 32], strides = [1, 1]} : vector<288x32xbf16> to vector<32x32xbf16>
    %cst_90 = arith.constant dense<0.000000e+00> : vector<8x32xf32>
    %157 = tpu.matmul %155, %156, %cst_90 {dimension_numbers = #tpu.dot_dimension_numbers<[1], [0], [0], [1], [0, 0, 1, 1], [], []>} : vector<8x32xbf16>, vector<32x32xbf16>, vector<8x32xf32> -> vector<8x32xf32>
    %158 = arith.addf %151, %157 : vector<8x32xf32>
    %c5_91 = arith.constant 5 : index
    %c0_92 = arith.constant 0 : index
    %c0_93 = arith.constant 0 : index
    %159 = vector.load %arg6[%c5_91, %c0_92, %c0_93] : memref<9x8x32xbf16, #tpu.memory_space<vmem>>, vector<1x8x32xbf16>
    %160 = vector.shape_cast %159 : vector<1x8x32xbf16> to vector<8x32xbf16>
    %cst_94 = arith.constant dense<0.000000e+00> : vector<8x32xf32>
    %161 = tpu.matmul %160, %121, %cst_94 {dimension_numbers = #tpu.dot_dimension_numbers<[1], [0], [0], [1], [0, 0, 1, 1], [], []>} : vector<8x32xbf16>, vector<32x32xbf16>, vector<8x32xf32> -> vector<8x32xf32>
    %162 = arith.truncf %161 : vector<8x32xf32> to vector<8x32xbf16>
    %163 = vector.extract_strided_slice %122 {offsets = [160, 0], sizes = [32, 32], strides = [1, 1]} : vector<288x32xbf16> to vector<32x32xbf16>
    %cst_95 = arith.constant dense<0.000000e+00> : vector<8x32xf32>
    %164 = tpu.matmul %162, %163, %cst_95 {dimension_numbers = #tpu.dot_dimension_numbers<[1], [0], [0], [1], [0, 0, 1, 1], [], []>} : vector<8x32xbf16>, vector<32x32xbf16>, vector<8x32xf32> -> vector<8x32xf32>
    %165 = arith.addf %158, %164 : vector<8x32xf32>
    %c6_96 = arith.constant 6 : index
    %c0_97 = arith.constant 0 : index
    %c0_98 = arith.constant 0 : index
    %166 = vector.load %arg6[%c6_96, %c0_97, %c0_98] : memref<9x8x32xbf16, #tpu.memory_space<vmem>>, vector<1x8x32xbf16>
    %167 = vector.shape_cast %166 : vector<1x8x32xbf16> to vector<8x32xbf16>
    %cst_99 = arith.constant dense<0.000000e+00> : vector<8x32xf32>
    %168 = tpu.matmul %167, %121, %cst_99 {dimension_numbers = #tpu.dot_dimension_numbers<[1], [0], [0], [1], [0, 0, 1, 1], [], []>} : vector<8x32xbf16>, vector<32x32xbf16>, vector<8x32xf32> -> vector<8x32xf32>
    %169 = arith.truncf %168 : vector<8x32xf32> to vector<8x32xbf16>
    %170 = vector.extract_strided_slice %122 {offsets = [192, 0], sizes = [32, 32], strides = [1, 1]} : vector<288x32xbf16> to vector<32x32xbf16>
    %cst_100 = arith.constant dense<0.000000e+00> : vector<8x32xf32>
    %171 = tpu.matmul %169, %170, %cst_100 {dimension_numbers = #tpu.dot_dimension_numbers<[1], [0], [0], [1], [0, 0, 1, 1], [], []>} : vector<8x32xbf16>, vector<32x32xbf16>, vector<8x32xf32> -> vector<8x32xf32>
    %172 = arith.addf %165, %171 : vector<8x32xf32>
    %c7_101 = arith.constant 7 : index
    %c0_102 = arith.constant 0 : index
    %c0_103 = arith.constant 0 : index
    %173 = vector.load %arg6[%c7_101, %c0_102, %c0_103] : memref<9x8x32xbf16, #tpu.memory_space<vmem>>, vector<1x8x32xbf16>
    %174 = vector.shape_cast %173 : vector<1x8x32xbf16> to vector<8x32xbf16>
    %cst_104 = arith.constant dense<0.000000e+00> : vector<8x32xf32>
    %175 = tpu.matmul %174, %121, %cst_104 {dimension_numbers = #tpu.dot_dimension_numbers<[1], [0], [0], [1], [0, 0, 1, 1], [], []>} : vector<8x32xbf16>, vector<32x32xbf16>, vector<8x32xf32> -> vector<8x32xf32>
    %176 = arith.truncf %175 : vector<8x32xf32> to vector<8x32xbf16>
    %177 = vector.extract_strided_slice %122 {offsets = [224, 0], sizes = [32, 32], strides = [1, 1]} : vector<288x32xbf16> to vector<32x32xbf16>
    %cst_105 = arith.constant dense<0.000000e+00> : vector<8x32xf32>
    %178 = tpu.matmul %176, %177, %cst_105 {dimension_numbers = #tpu.dot_dimension_numbers<[1], [0], [0], [1], [0, 0, 1, 1], [], []>} : vector<8x32xbf16>, vector<32x32xbf16>, vector<8x32xf32> -> vector<8x32xf32>
    %179 = arith.addf %172, %178 : vector<8x32xf32>
    %c8_106 = arith.constant 8 : index
    %c0_107 = arith.constant 0 : index
    %c0_108 = arith.constant 0 : index
    %180 = vector.load %arg6[%c8_106, %c0_107, %c0_108] : memref<9x8x32xbf16, #tpu.memory_space<vmem>>, vector<1x8x32xbf16>
    %181 = vector.shape_cast %180 : vector<1x8x32xbf16> to vector<8x32xbf16>
    %cst_109 = arith.constant dense<0.000000e+00> : vector<8x32xf32>
    %182 = tpu.matmul %181, %121, %cst_109 {dimension_numbers = #tpu.dot_dimension_numbers<[1], [0], [0], [1], [0, 0, 1, 1], [], []>} : vector<8x32xbf16>, vector<32x32xbf16>, vector<8x32xf32> -> vector<8x32xf32>
    %183 = arith.truncf %182 : vector<8x32xf32> to vector<8x32xbf16>
    %184 = vector.extract_strided_slice %122 {offsets = [256, 0], sizes = [32, 32], strides = [1, 1]} : vector<288x32xbf16> to vector<32x32xbf16>
    %cst_110 = arith.constant dense<0.000000e+00> : vector<8x32xf32>
    %185 = tpu.matmul %183, %184, %cst_110 {dimension_numbers = #tpu.dot_dimension_numbers<[1], [0], [0], [1], [0, 0, 1, 1], [], []>} : vector<8x32xbf16>, vector<32x32xbf16>, vector<8x32xf32> -> vector<8x32xf32>
    %186 = arith.addf %179, %185 : vector<8x32xf32>
    %c0_111 = arith.constant 0 : index
    %c0_112 = arith.constant 0 : index
    %187 = vector.load %arg8[%c0_111, %c0_112] : memref<2x32xf32, #tpu.memory_space<vmem>>, vector<1x32xf32>
    %c1_113 = arith.constant 1 : index
    %c0_114 = arith.constant 0 : index
    %188 = vector.load %arg8[%c1_113, %c0_114] : memref<2x32xf32, #tpu.memory_space<vmem>>, vector<1x32xf32>
    %cst_115 = arith.constant dense<0.000000e+00> : vector<32xf32>
    %189 = vector.multi_reduction <add>, %186, %cst_115 [0] : vector<8x32xf32> to vector<32xf32>
    %190 = vector.shape_cast %189 : vector<32xf32> to vector<1x32xf32>
    %cst_116 = arith.constant 8.000000e+00 : f32
    %191 = vector.broadcast %cst_116 : f32 to vector<1x32xf32>
    %192 = arith.divf %190, %191 : vector<1x32xf32>
    %193 = vector.broadcast %192 : vector<1x32xf32> to vector<8x32xf32>
    %194 = arith.subf %186, %193 : vector<8x32xf32>
    %195 = arith.mulf %194, %194 : vector<8x32xf32>
    %cst_117 = arith.constant dense<0.000000e+00> : vector<32xf32>
    %196 = vector.multi_reduction <add>, %195, %cst_117 [0] : vector<8x32xf32> to vector<32xf32>
    %197 = vector.shape_cast %196 : vector<32xf32> to vector<1x32xf32>
    %cst_118 = arith.constant 8.000000e+00 : f32
    %198 = vector.broadcast %cst_118 : f32 to vector<1x32xf32>
    %199 = arith.divf %197, %198 : vector<1x32xf32>
    %200 = vector.broadcast %192 : vector<1x32xf32> to vector<8x32xf32>
    %201 = arith.subf %186, %200 : vector<8x32xf32>
    %cst_119 = arith.constant 9.99999974E-6 : f32
    %202 = vector.broadcast %cst_119 : f32 to vector<1x32xf32>
    %203 = arith.addf %199, %202 : vector<1x32xf32>
    %204 = math.rsqrt %203 : vector<1x32xf32>
    %205 = vector.broadcast %204 : vector<1x32xf32> to vector<8x32xf32>
    %206 = arith.mulf %201, %205 : vector<8x32xf32>
    %207 = vector.broadcast %187 : vector<1x32xf32> to vector<8x32xf32>
    %208 = arith.mulf %206, %207 : vector<8x32xf32>
    %209 = vector.broadcast %188 : vector<1x32xf32> to vector<8x32xf32>
    %210 = arith.addf %208, %209 : vector<8x32xf32>
    %cst_120 = arith.constant 0.000000e+00 : f32
    %211 = vector.broadcast %cst_120 : f32 to vector<8x32xf32>
    %212 = arith.maximumf %210, %211 : vector<8x32xf32>
    %213 = arith.truncf %212 : vector<8x32xf32> to vector<8x32xbf16>
    %c0_121 = arith.constant 0 : index
    %c0_122 = arith.constant 0 : index
    %214 = vector.load %arg10[%c0_121, %c0_122] : memref<288x32xbf16, #tpu.memory_space<vmem>>, vector<288x32xbf16>
    %cst_123 = arith.constant 0.000000e+00 : f32
    %215 = vector.broadcast %cst_123 : f32 to vector<2x32xf32>
    %c0_124 = arith.constant 0 : index
    %c0_125 = arith.constant 0 : index
    %c0_126 = arith.constant 0 : index
    %216 = vector.load %arg9[%c0_124, %c0_125, %c0_126] : memref<9x2x8xbf16, #tpu.memory_space<vmem>>, vector<1x2x8xbf16>
    %217 = vector.shape_cast %216 : vector<1x2x8xbf16> to vector<2x8xbf16>
    %cst_127 = arith.constant dense<0.000000e+00> : vector<2x32xf32>
    %218 = tpu.matmul %217, %213, %cst_127 {dimension_numbers = #tpu.dot_dimension_numbers<[1], [0], [0], [1], [0, 0, 1, 1], [], []>} : vector<2x8xbf16>, vector<8x32xbf16>, vector<2x32xf32> -> vector<2x32xf32>
    %219 = arith.truncf %218 : vector<2x32xf32> to vector<2x32xbf16>
    %220 = vector.extract_strided_slice %214 {offsets = [0, 0], sizes = [32, 32], strides = [1, 1]} : vector<288x32xbf16> to vector<32x32xbf16>
    %cst_128 = arith.constant dense<0.000000e+00> : vector<2x32xf32>
    %221 = tpu.matmul %219, %220, %cst_128 {dimension_numbers = #tpu.dot_dimension_numbers<[1], [0], [0], [1], [0, 0, 1, 1], [], []>} : vector<2x32xbf16>, vector<32x32xbf16>, vector<2x32xf32> -> vector<2x32xf32>
    %222 = arith.addf %215, %221 : vector<2x32xf32>
    %c1_129 = arith.constant 1 : index
    %c0_130 = arith.constant 0 : index
    %c0_131 = arith.constant 0 : index
    %223 = vector.load %arg9[%c1_129, %c0_130, %c0_131] : memref<9x2x8xbf16, #tpu.memory_space<vmem>>, vector<1x2x8xbf16>
    %224 = vector.shape_cast %223 : vector<1x2x8xbf16> to vector<2x8xbf16>
    %cst_132 = arith.constant dense<0.000000e+00> : vector<2x32xf32>
    %225 = tpu.matmul %224, %213, %cst_132 {dimension_numbers = #tpu.dot_dimension_numbers<[1], [0], [0], [1], [0, 0, 1, 1], [], []>} : vector<2x8xbf16>, vector<8x32xbf16>, vector<2x32xf32> -> vector<2x32xf32>
    %226 = arith.truncf %225 : vector<2x32xf32> to vector<2x32xbf16>
    %227 = vector.extract_strided_slice %214 {offsets = [32, 0], sizes = [32, 32], strides = [1, 1]} : vector<288x32xbf16> to vector<32x32xbf16>
    %cst_133 = arith.constant dense<0.000000e+00> : vector<2x32xf32>
    %228 = tpu.matmul %226, %227, %cst_133 {dimension_numbers = #tpu.dot_dimension_numbers<[1], [0], [0], [1], [0, 0, 1, 1], [], []>} : vector<2x32xbf16>, vector<32x32xbf16>, vector<2x32xf32> -> vector<2x32xf32>
    %229 = arith.addf %222, %228 : vector<2x32xf32>
    %c2_134 = arith.constant 2 : index
    %c0_135 = arith.constant 0 : index
    %c0_136 = arith.constant 0 : index
    %230 = vector.load %arg9[%c2_134, %c0_135, %c0_136] : memref<9x2x8xbf16, #tpu.memory_space<vmem>>, vector<1x2x8xbf16>
    %231 = vector.shape_cast %230 : vector<1x2x8xbf16> to vector<2x8xbf16>
    %cst_137 = arith.constant dense<0.000000e+00> : vector<2x32xf32>
    %232 = tpu.matmul %231, %213, %cst_137 {dimension_numbers = #tpu.dot_dimension_numbers<[1], [0], [0], [1], [0, 0, 1, 1], [], []>} : vector<2x8xbf16>, vector<8x32xbf16>, vector<2x32xf32> -> vector<2x32xf32>
    %233 = arith.truncf %232 : vector<2x32xf32> to vector<2x32xbf16>
    %234 = vector.extract_strided_slice %214 {offsets = [64, 0], sizes = [32, 32], strides = [1, 1]} : vector<288x32xbf16> to vector<32x32xbf16>
    %cst_138 = arith.constant dense<0.000000e+00> : vector<2x32xf32>
    %235 = tpu.matmul %233, %234, %cst_138 {dimension_numbers = #tpu.dot_dimension_numbers<[1], [0], [0], [1], [0, 0, 1, 1], [], []>} : vector<2x32xbf16>, vector<32x32xbf16>, vector<2x32xf32> -> vector<2x32xf32>
    %236 = arith.addf %229, %235 : vector<2x32xf32>
    %c3_139 = arith.constant 3 : index
    %c0_140 = arith.constant 0 : index
    %c0_141 = arith.constant 0 : index
    %237 = vector.load %arg9[%c3_139, %c0_140, %c0_141] : memref<9x2x8xbf16, #tpu.memory_space<vmem>>, vector<1x2x8xbf16>
    %238 = vector.shape_cast %237 : vector<1x2x8xbf16> to vector<2x8xbf16>
    %cst_142 = arith.constant dense<0.000000e+00> : vector<2x32xf32>
    %239 = tpu.matmul %238, %213, %cst_142 {dimension_numbers = #tpu.dot_dimension_numbers<[1], [0], [0], [1], [0, 0, 1, 1], [], []>} : vector<2x8xbf16>, vector<8x32xbf16>, vector<2x32xf32> -> vector<2x32xf32>
    %240 = arith.truncf %239 : vector<2x32xf32> to vector<2x32xbf16>
    %241 = vector.extract_strided_slice %214 {offsets = [96, 0], sizes = [32, 32], strides = [1, 1]} : vector<288x32xbf16> to vector<32x32xbf16>
    %cst_143 = arith.constant dense<0.000000e+00> : vector<2x32xf32>
    %242 = tpu.matmul %240, %241, %cst_143 {dimension_numbers = #tpu.dot_dimension_numbers<[1], [0], [0], [1], [0, 0, 1, 1], [], []>} : vector<2x32xbf16>, vector<32x32xbf16>, vector<2x32xf32> -> vector<2x32xf32>
    %243 = arith.addf %236, %242 : vector<2x32xf32>
    %c4_144 = arith.constant 4 : index
    %c0_145 = arith.constant 0 : index
    %c0_146 = arith.constant 0 : index
    %244 = vector.load %arg9[%c4_144, %c0_145, %c0_146] : memref<9x2x8xbf16, #tpu.memory_space<vmem>>, vector<1x2x8xbf16>
    %245 = vector.shape_cast %244 : vector<1x2x8xbf16> to vector<2x8xbf16>
    %cst_147 = arith.constant dense<0.000000e+00> : vector<2x32xf32>
    %246 = tpu.matmul %245, %213, %cst_147 {dimension_numbers = #tpu.dot_dimension_numbers<[1], [0], [0], [1], [0, 0, 1, 1], [], []>} : vector<2x8xbf16>, vector<8x32xbf16>, vector<2x32xf32> -> vector<2x32xf32>
    %247 = arith.truncf %246 : vector<2x32xf32> to vector<2x32xbf16>
    %248 = vector.extract_strided_slice %214 {offsets = [128, 0], sizes = [32, 32], strides = [1, 1]} : vector<288x32xbf16> to vector<32x32xbf16>
    %cst_148 = arith.constant dense<0.000000e+00> : vector<2x32xf32>
    %249 = tpu.matmul %247, %248, %cst_148 {dimension_numbers = #tpu.dot_dimension_numbers<[1], [0], [0], [1], [0, 0, 1, 1], [], []>} : vector<2x32xbf16>, vector<32x32xbf16>, vector<2x32xf32> -> vector<2x32xf32>
    %250 = arith.addf %243, %249 : vector<2x32xf32>
    %c5_149 = arith.constant 5 : index
    %c0_150 = arith.constant 0 : index
    %c0_151 = arith.constant 0 : index
    %251 = vector.load %arg9[%c5_149, %c0_150, %c0_151] : memref<9x2x8xbf16, #tpu.memory_space<vmem>>, vector<1x2x8xbf16>
    %252 = vector.shape_cast %251 : vector<1x2x8xbf16> to vector<2x8xbf16>
    %cst_152 = arith.constant dense<0.000000e+00> : vector<2x32xf32>
    %253 = tpu.matmul %252, %213, %cst_152 {dimension_numbers = #tpu.dot_dimension_numbers<[1], [0], [0], [1], [0, 0, 1, 1], [], []>} : vector<2x8xbf16>, vector<8x32xbf16>, vector<2x32xf32> -> vector<2x32xf32>
    %254 = arith.truncf %253 : vector<2x32xf32> to vector<2x32xbf16>
    %255 = vector.extract_strided_slice %214 {offsets = [160, 0], sizes = [32, 32], strides = [1, 1]} : vector<288x32xbf16> to vector<32x32xbf16>
    %cst_153 = arith.constant dense<0.000000e+00> : vector<2x32xf32>
    %256 = tpu.matmul %254, %255, %cst_153 {dimension_numbers = #tpu.dot_dimension_numbers<[1], [0], [0], [1], [0, 0, 1, 1], [], []>} : vector<2x32xbf16>, vector<32x32xbf16>, vector<2x32xf32> -> vector<2x32xf32>
    %257 = arith.addf %250, %256 : vector<2x32xf32>
    %c6_154 = arith.constant 6 : index
    %c0_155 = arith.constant 0 : index
    %c0_156 = arith.constant 0 : index
    %258 = vector.load %arg9[%c6_154, %c0_155, %c0_156] : memref<9x2x8xbf16, #tpu.memory_space<vmem>>, vector<1x2x8xbf16>
    %259 = vector.shape_cast %258 : vector<1x2x8xbf16> to vector<2x8xbf16>
    %cst_157 = arith.constant dense<0.000000e+00> : vector<2x32xf32>
    %260 = tpu.matmul %259, %213, %cst_157 {dimension_numbers = #tpu.dot_dimension_numbers<[1], [0], [0], [1], [0, 0, 1, 1], [], []>} : vector<2x8xbf16>, vector<8x32xbf16>, vector<2x32xf32> -> vector<2x32xf32>
    %261 = arith.truncf %260 : vector<2x32xf32> to vector<2x32xbf16>
    %262 = vector.extract_strided_slice %214 {offsets = [192, 0], sizes = [32, 32], strides = [1, 1]} : vector<288x32xbf16> to vector<32x32xbf16>
    %cst_158 = arith.constant dense<0.000000e+00> : vector<2x32xf32>
    %263 = tpu.matmul %261, %262, %cst_158 {dimension_numbers = #tpu.dot_dimension_numbers<[1], [0], [0], [1], [0, 0, 1, 1], [], []>} : vector<2x32xbf16>, vector<32x32xbf16>, vector<2x32xf32> -> vector<2x32xf32>
    %264 = arith.addf %257, %263 : vector<2x32xf32>
    %c7_159 = arith.constant 7 : index
    %c0_160 = arith.constant 0 : index
    %c0_161 = arith.constant 0 : index
    %265 = vector.load %arg9[%c7_159, %c0_160, %c0_161] : memref<9x2x8xbf16, #tpu.memory_space<vmem>>, vector<1x2x8xbf16>
    %266 = vector.shape_cast %265 : vector<1x2x8xbf16> to vector<2x8xbf16>
    %cst_162 = arith.constant dense<0.000000e+00> : vector<2x32xf32>
    %267 = tpu.matmul %266, %213, %cst_162 {dimension_numbers = #tpu.dot_dimension_numbers<[1], [0], [0], [1], [0, 0, 1, 1], [], []>} : vector<2x8xbf16>, vector<8x32xbf16>, vector<2x32xf32> -> vector<2x32xf32>
    %268 = arith.truncf %267 : vector<2x32xf32> to vector<2x32xbf16>
    %269 = vector.extract_strided_slice %214 {offsets = [224, 0], sizes = [32, 32], strides = [1, 1]} : vector<288x32xbf16> to vector<32x32xbf16>
    %cst_163 = arith.constant dense<0.000000e+00> : vector<2x32xf32>
    %270 = tpu.matmul %268, %269, %cst_163 {dimension_numbers = #tpu.dot_dimension_numbers<[1], [0], [0], [1], [0, 0, 1, 1], [], []>} : vector<2x32xbf16>, vector<32x32xbf16>, vector<2x32xf32> -> vector<2x32xf32>
    %271 = arith.addf %264, %270 : vector<2x32xf32>
    %c8_164 = arith.constant 8 : index
    %c0_165 = arith.constant 0 : index
    %c0_166 = arith.constant 0 : index
    %272 = vector.load %arg9[%c8_164, %c0_165, %c0_166] : memref<9x2x8xbf16, #tpu.memory_space<vmem>>, vector<1x2x8xbf16>
    %273 = vector.shape_cast %272 : vector<1x2x8xbf16> to vector<2x8xbf16>
    %cst_167 = arith.constant dense<0.000000e+00> : vector<2x32xf32>
    %274 = tpu.matmul %273, %213, %cst_167 {dimension_numbers = #tpu.dot_dimension_numbers<[1], [0], [0], [1], [0, 0, 1, 1], [], []>} : vector<2x8xbf16>, vector<8x32xbf16>, vector<2x32xf32> -> vector<2x32xf32>
    %275 = arith.truncf %274 : vector<2x32xf32> to vector<2x32xbf16>
    %276 = vector.extract_strided_slice %214 {offsets = [256, 0], sizes = [32, 32], strides = [1, 1]} : vector<288x32xbf16> to vector<32x32xbf16>
    %cst_168 = arith.constant dense<0.000000e+00> : vector<2x32xf32>
    %277 = tpu.matmul %275, %276, %cst_168 {dimension_numbers = #tpu.dot_dimension_numbers<[1], [0], [0], [1], [0, 0, 1, 1], [], []>} : vector<2x32xbf16>, vector<32x32xbf16>, vector<2x32xf32> -> vector<2x32xf32>
    %278 = arith.addf %271, %277 : vector<2x32xf32>
    %c0_169 = arith.constant 0 : index
    %c0_170 = arith.constant 0 : index
    %279 = vector.load %arg11[%c0_169, %c0_170] : memref<2x32xf32, #tpu.memory_space<vmem>>, vector<1x32xf32>
    %c1_171 = arith.constant 1 : index
    %c0_172 = arith.constant 0 : index
    %280 = vector.load %arg11[%c1_171, %c0_172] : memref<2x32xf32, #tpu.memory_space<vmem>>, vector<1x32xf32>
    %cst_173 = arith.constant dense<0.000000e+00> : vector<32xf32>
    %281 = vector.multi_reduction <add>, %278, %cst_173 [0] : vector<2x32xf32> to vector<32xf32>
    %282 = vector.shape_cast %281 : vector<32xf32> to vector<1x32xf32>
    %cst_174 = arith.constant 2.000000e+00 : f32
    %283 = vector.broadcast %cst_174 : f32 to vector<1x32xf32>
    %284 = arith.divf %282, %283 : vector<1x32xf32>
    %285 = vector.broadcast %284 : vector<1x32xf32> to vector<2x32xf32>
    %286 = arith.subf %278, %285 : vector<2x32xf32>
    %287 = arith.mulf %286, %286 : vector<2x32xf32>
    %cst_175 = arith.constant dense<0.000000e+00> : vector<32xf32>
    %288 = vector.multi_reduction <add>, %287, %cst_175 [0] : vector<2x32xf32> to vector<32xf32>
    %289 = vector.shape_cast %288 : vector<32xf32> to vector<1x32xf32>
    %cst_176 = arith.constant 2.000000e+00 : f32
    %290 = vector.broadcast %cst_176 : f32 to vector<1x32xf32>
    %291 = arith.divf %289, %290 : vector<1x32xf32>
    %292 = vector.broadcast %284 : vector<1x32xf32> to vector<2x32xf32>
    %293 = arith.subf %278, %292 : vector<2x32xf32>
    %cst_177 = arith.constant 9.99999974E-6 : f32
    %294 = vector.broadcast %cst_177 : f32 to vector<1x32xf32>
    %295 = arith.addf %291, %294 : vector<1x32xf32>
    %296 = math.rsqrt %295 : vector<1x32xf32>
    %297 = vector.broadcast %296 : vector<1x32xf32> to vector<2x32xf32>
    %298 = arith.mulf %293, %297 : vector<2x32xf32>
    %299 = vector.broadcast %279 : vector<1x32xf32> to vector<2x32xf32>
    %300 = arith.mulf %298, %299 : vector<2x32xf32>
    %301 = vector.broadcast %280 : vector<1x32xf32> to vector<2x32xf32>
    %302 = arith.addf %300, %301 : vector<2x32xf32>
    %cst_178 = arith.constant 0.000000e+00 : f32
    %303 = vector.broadcast %cst_178 : f32 to vector<2x32xf32>
    %304 = arith.maximumf %302, %303 : vector<2x32xf32>
    %305 = arith.truncf %304 : vector<2x32xf32> to vector<2x32xbf16>
    %c0_179 = arith.constant 0 : index
    %c0_180 = arith.constant 0 : index
    %306 = vector.load %arg12[%c0_179, %c0_180] : memref<32x200xbf16, #tpu.memory_space<vmem>>, vector<32x200xbf16>
    %cst_181 = arith.constant dense<0.000000e+00> : vector<2x200xf32>
    %307 = tpu.matmul %305, %306, %cst_181 {dimension_numbers = #tpu.dot_dimension_numbers<[1], [0], [0], [1], [0, 0, 1, 1], [], []>} : vector<2x32xbf16>, vector<32x200xbf16>, vector<2x200xf32> -> vector<2x200xf32>
    %c0_182 = arith.constant 0 : index
    %c0_183 = arith.constant 0 : index
    %308 = vector.load %arg13[%c0_182, %c0_183] : memref<1x200xf32, #tpu.memory_space<vmem>>, vector<1x200xf32>
    %309 = vector.broadcast %308 : vector<1x200xf32> to vector<2x200xf32>
    %310 = arith.addf %307, %309 : vector<2x200xf32>
    %cst_184 = arith.constant 0.000000e+00 : f32
    %311 = vector.broadcast %cst_184 : f32 to vector<2x200xf32>
    %312 = arith.maximumf %310, %311 : vector<2x200xf32>
    %313 = arith.truncf %312 : vector<2x200xf32> to vector<2x200xbf16>
    %c0_185 = arith.constant 0 : index
    %c0_186 = arith.constant 0 : index
    %314 = vector.load %arg14[%c0_185, %c0_186] : memref<200x128xbf16, #tpu.memory_space<vmem>>, vector<200x128xbf16>
    %cst_187 = arith.constant dense<0.000000e+00> : vector<2x128xf32>
    %315 = tpu.matmul %313, %314, %cst_187 {dimension_numbers = #tpu.dot_dimension_numbers<[1], [0], [0], [1], [0, 0, 1, 1], [], []>} : vector<2x200xbf16>, vector<200x128xbf16>, vector<2x128xf32> -> vector<2x128xf32>
    %c0_188 = arith.constant 0 : index
    %c0_189 = arith.constant 0 : index
    %316 = vector.load %arg15[%c0_188, %c0_189] : memref<1x128xf32, #tpu.memory_space<vmem>>, vector<1x128xf32>
    %317 = vector.broadcast %316 : vector<1x128xf32> to vector<2x128xf32>
    %318 = arith.addf %315, %317 : vector<2x128xf32>
    %319 = tpu.iota {dimensions = array<i32: 1>} : vector<2x128xi32>
    %c6_i32 = arith.constant 6 : i32
    %320 = vector.broadcast %c6_i32 : i32 to vector<2x128xi32>
    %321 = arith.cmpi slt, %319, %320 : vector<2x128xi32>
    %cst_190 = arith.constant -1.000000e+30 : f32
    %322 = vector.broadcast %cst_190 : f32 to vector<2x128xf32>
    %323 = arith.select %321, %318, %322 : vector<2x128xi1>, vector<2x128xf32>
    %cst_191 = arith.constant dense<0xFF800000> : vector<2xf32>
    %324 = vector.multi_reduction <maximumf>, %323, %cst_191 [1] : vector<2x128xf32> to vector<2xf32>
    %325 = vector.shape_cast %324 : vector<2xf32> to vector<2x1xf32>
    %326 = vector.broadcast %325 : vector<2x1xf32> to vector<2x128xf32>
    %327 = arith.subf %323, %326 : vector<2x128xf32>
    %328 = math.exp %327 : vector<2x128xf32>
    %cst_192 = arith.constant dense<0.000000e+00> : vector<2xf32>
    %329 = vector.multi_reduction <add>, %328, %cst_192 [1] : vector<2x128xf32> to vector<2xf32>
    %330 = vector.shape_cast %329 : vector<2xf32> to vector<2x1xf32>
    %331 = tpu.reciprocal %330 {approx = true} : vector<2x1xf32> -> vector<2x1xf32>
    %332 = vector.broadcast %331 : vector<2x1xf32> to vector<2x128xf32>
    %333 = arith.mulf %328, %332 : vector<2x128xf32>
    %334 = arith.select %321, %333, %318 : vector<2x128xi1>, vector<2x128xf32>
    %c0_193 = arith.constant 0 : index
    %c0_194 = arith.constant 0 : index
    %335 = vector.load %arg16[%c0_193, %c0_194] : memref<2x128xf32, #tpu.memory_space<vmem>>, vector<2x128xf32>
    tpu.vector_store %arg16[%c0_193, %c0_194], %334 {strides = array<i32>} : memref<2x128xf32, #tpu.memory_space<vmem>>, vector<2x128xf32>,
    return
  }
}

</mosaic_0001>

<bundles_post_ra>
// kernel: actor_critic_forward.1
= control target key start
LH: loop header
LB: loop body
LE: loop exit
PB: predicated region body
PF: predicated region fallthrough
CT: control target
= control target key end

     0   :  { %vm130_vm0 = vcmask 326656   ;;  %vm155_vm1 = vcmask 1043456   ;;  %vm258_vm2 = vcmask 261120   ;;  %vm5250_vm3 = vmmov 0   ;;  %s6252_s1 = inlined_call_operand.vmem [shape: bf16[40,32], index: 1, kind: input, shape index: {}]   ;;  %s6253_s0 = inlined_call_operand.vmem [shape: bf16[128,40], index: 0, kind: input, shape index: {}]   ;;  %s6254_s3 = inlined_call_operand.vmem [shape: bf16[9,32,128], index: 3, kind: input, shape index: {}]   ;;  %s6255_s4 = inlined_call_operand.vmem [shape: bf16[288,32], index: 4, kind: input, shape index: {}]   ;;  %s6256_s2 = inlined_call_operand.vmem [shape: f32[2,32], index: 2, kind: input, shape index: {}]   ;;  %s6257_s5 = inlined_call_operand.vmem [shape: f32[2,32], index: 5, kind: input, shape index: {}]   ;;  %s6258_s6 = inlined_call_operand.vmem [shape: bf16[9,8,32], index: 6, kind: input, shape index: {}]   ;;  %s6259_s7 = inlined_call_operand.vmem [shape: bf16[288,32], index: 7, kind: input, shape index: {}]   ;;  %s6260_s10 = inlined_call_operand.vmem [shape: bf16[288,32], index: 10, kind: input, shape index: {}]   ;;  %s6261_s8 = inlined_call_operand.vmem [shape: f32[2,32], index: 8, kind: input, shape index: {}]   ;;  %s6262_s9 = inlined_call_operand.vmem [shape: bf16[9,2,8], index: 9, kind: input, shape index: {}]   ;;  %s6263_s12 = inlined_call_operand.vmem [shape: bf16[32,200], index: 12, kind: input, shape index: {}]   ;;  %s6264_s14 = inlined_call_operand.vmem [shape: bf16[200,128], index: 14, kind: input, shape index: {}]   ;;  %s6265_s11 = inlined_call_operand.vmem [shape: f32[2,32], index: 11, kind: input, shape index: {}]   ;;  %s6266_s13 = inlined_call_operand.vmem [shape: f32[1,200], index: 13, kind: input, shape index: {}]   ;;  %s6267_s15 = inlined_call_operand.vmem [shape: f32[1,128], index: 15, kind: input, shape index: {}]   ;;  %s6268_s16 = inlined_call_operand.vmem [shape: f32[2,128], index: 16, kind: output, shape index: {}]  }
   0x1   :  { %6270 = sst [smem:[#allocation2_spill]] %s6252_s1  ;;  %v5138_v2 = vld [vmem:[%s6253_s0] sm:$0xff]   ;;  %v5139_v5 = vld [vmem:[%s6253_s0 + $0x8] sm:$0xff]   ;;  %v5140_v6 = vld [vmem:[%s6253_s0 + $0x10] sm:$0xff]   ;;  %vm2819_vm4 = vcmask 64512   ;;  %vm3739_vm5 = vcmask 254976  }
   0x2   :  { %s6271_s23 = sld [smem:[#allocation2_spill]]  ;;  %4497 = vmatprep.mubr.msk.bf16.mxu0 %vm130_vm0, %v5138_v2  ;;  %v5141_v7 = vld [vmem:[%s6253_s0 + $0x18] sm:$0xff]   ;;  %v5142_v8 = vld [vmem:[%s6253_s0 + $0x20] sm:$0xff]   ;;  %v5143_v9 = vld [vmem:[%s6253_s0 + $0x28] sm:$0xff]   ;;  %vm3965_vm6 = vcmask 588800   ;;  %vm4016_vm8 = vcmask 1041408  }
   0x3   :  { %v5144_v10 = vld [vmem:[%s6253_s0 + $0x30] sm:$0xff]   ;;  %v5145_v11 = vld [vmem:[%s6253_s0 + $0x38] sm:$0xff]   ;;  %v5146_v60 = vld [vmem:[%s6254_s3] sm:$0xff]  }
   0x4   :  { %v5147_v61 = vld [vmem:[%s6254_s3 + $0x20] sm:$0xff]   ;;  %4529 = vmatprep.mubr.bf16.mxu1 %v5146_v60 }
   0x8   :  { %v5135_v0 = vld [vmem:[%s6271_s23] sm:$0xff]   ;;  %v5136_v1 = vld [vmem:[%s6271_s23 + $0x8] sm:$0xff]   ;;  %v5137_v3 = vld [vmem:[%s6271_s23 + $0x10] ss:$0 sps:$4 sm:$0xff]  }
   0x9   :  { %4491 = vmatprep.subr.bf16.mxu0 %v5135_v0  ;;  %v157_v4 = vsel %vm155_vm1, %v5137_v3, 0 }
   0xa   :  { %4492 = vmatpush3.bf16.msra.mxu0 %v5135_v0 }
   0xb   :  { %4493 = vmatprep.subr.bf16.mxu0 %v5136_v1 }
   0xe   :  { %4494 = vmatpush3.bf16.msra.mxu0 %v5136_v1 }
   0xf   :  { %5131 = vmatprep.subr.msk.bf16.mxu0 %vm155_vm1, %v5137_v3 }
  0x12   :  { %4496 = vmatpush3.bf16.msra.mxu0 %v157_v4 }
  0x15   :  { %4498 = vmatmul.mubr.msk.bf16.vlgmr.msra.gmra.mrb[0].mxu0 %vm130_vm0, %v5139_v5 }
  0x16   :  { %4501 = vmatprep.mubr.msk.bf16.mxu0 %vm130_vm0, %v5140_v6 }
  0x1d   :  { %4502 = vmatmul.mubr.msk.bf16.gmra.mrb[4].mxu0 %vm130_vm0, %v5141_v7 }
  0x1e   :  { %4505 = vmatprep.mubr.msk.bf16.mxu0 %vm130_vm0, %v5142_v8 }
  0x25   :  { %4506 = vmatmul.mubr.msk.bf16.gmra.mrb[8].mxu0 %vm130_vm0, %v5143_v9 }
  0x26   :  { %4509 = vmatprep.mubr.msk.bf16.mxu0 %vm130_vm0, %v5144_v10 }
  0x2d   :  { %4510 = vmatmul.mubr.msk.bf16.gmra.mrb[12].mxu0 %vm130_vm0, %v5145_v11 }
  0x2e   :  { %4585 = vmatprep.mubr.bf16.mxu0 %v5147_v61 }
  0xe8   :  { %v5380_v12 = vpop.f32.mrb[0].mxu0 }
  0xe9   :  { %v193_v13 = vpop.f32.mrb[1].mxu0  ;;  %v262_v19 = vsel %vm258_vm2, %v5380_v12, 0.0 }
  0xea   :  { %v4500_v14 = vpop.f32.mrb[2].mxu0  ;;  %v259_v16 = vsel %vm258_vm2, %v193_v13, 0.0 }
  0xeb   :  { %v196_v15 = vpop.f32.mrb[3].mxu0  ;;  %v264_v21 = vsel %vm258_vm2, %v4500_v14, 0.0 }
  0xec   :  { %v260_v17 = vsel %vm258_vm2, %v196_v15, 0.0 }
  0xed   :  { %v261_v18 = vadd.f32 %v260_v17, %v259_v16 }
  0xef   :  { %v263_v20 = vadd.f32 %v262_v19, %v261_v18 }
  0xf0   :  { %v4503_v22 = vpop.f32.mrb[4].mxu0 }
  0xf1   :  { %v209_v23 = vpop.f32.mrb[5].mxu0  ;;  %v265_v24 = vadd.f32 %v264_v21, %v263_v20  ;;  %v270_v31 = vsel %vm258_vm2, %v4503_v22, 0.0 }
  0xf2   :  { %v266_v25 = vsel %vm258_vm2, %v209_v23, 0.0  ;;  %v4504_v26 = vpop.f32.mrb[6].mxu0 }
  0xf3   :  { %v267_v27 = vadd.f32 %v266_v25, %v265_v24  ;;  %v212_v28 = vpop.f32.mrb[7].mxu0  ;;  %v272_v33 = vsel %vm258_vm2, %v4504_v26, 0.0 }
  0xf4   :  { %v268_v29 = vsel %vm258_vm2, %v212_v28, 0.0 }
  0xf5   :  { %v269_v30 = vadd.f32 %v268_v29, %v267_v27 }
  0xf7   :  { %v271_v32 = vadd.f32 %v270_v31, %v269_v30 }
  0xf8   :  { %v4507_v34 = vpop.f32.mrb[8].mxu0 }
  0xf9   :  { %v225_v35 = vpop.f32.mrb[9].mxu0  ;;  %v273_v36 = vadd.f32 %v272_v33, %v271_v32  ;;  %v278_v43 = vsel %vm258_vm2, %v4507_v34, 0.0 }
  0xfa   :  { %v274_v37 = vsel %vm258_vm2, %v225_v35, 0.0  ;;  %v4508_v38 = vpop.f32.mrb[10].mxu0 }
  0xfb   :  { %v275_v39 = vadd.f32 %v274_v37, %v273_v36  ;;  %v228_v40 = vpop.f32.mrb[11].mxu0  ;;  %v280_v45 = vsel %vm258_vm2, %v4508_v38, 0.0 }
  0xfc   :  { %v276_v41 = vsel %vm258_vm2, %v228_v40, 0.0 }
  0xfd   :  { %v277_v42 = vadd.f32 %v276_v41, %v275_v39 }
  0xff   :  { %v279_v44 = vadd.f32 %v278_v43, %v277_v42 }
 0x100   :  { %v4511_v46 = vpop.f32.mrb[12].mxu0 }
 0x101   :  { %v241_v47 = vpop.f32.mrb[13].mxu0  ;;  %v281_v48 = vadd.f32 %v280_v45, %v279_v44  ;;  %v286_v55 = vsel %vm258_vm2, %v4511_v46, 0.0 }
 0x102   :  { %v282_v49 = vsel %vm258_vm2, %v241_v47, 0.0  ;;  %v4512_v50 = vpop.f32.mrb[14].mxu0 }
 0x103   :  { %v283_v51 = vadd.f32 %v282_v49, %v281_v48  ;;  %v244_v52 = vpop.f32.mrb[15].mxu0  ;;  %v288_v57 = vsel %vm258_vm2, %v4512_v50, 0.0 }
 0x104   :  { %v284_v53 = vsel %vm258_vm2, %v244_v52, 0.0 }
 0x105   :  { %v285_v54 = vadd.f32 %v284_v53, %v283_v51 }
 0x107   :  { %v287_v56 = vadd.f32 %v286_v55, %v285_v54 }
 0x109   :  { %v289_v58 = vadd.f32 %v288_v57, %v287_v56 }
 0x10b   :  { %v290_v59 = vrot.slane %v289_v58, 4 }
 0x10d   :  { %v291_v62 = vadd.f32 %v290_v59, %v289_v58 }
 0x10f   :  { %v292_v63 = vrot.slane %v291_v62, 2 }
 0x111   :  { %v293_v0 = vadd.f32 %v292_v63, %v291_v62 }
 0x113   :  { %v294_v1 = vrot.slane %v293_v0, 1 }
 0x115   :  { %v295_v2 = vadd.f32 %v294_v1, %v293_v0 }
 0x117   :  { %v297_v3 = vmul.f32 0.0078125, %v295_v2 }
 0x119   :  { %v5405_v4 = vsub.f32 %v193_v13, %v297_v3  ;;  %v5407_v5 = vsub.f32 %v196_v15, %v297_v3  ;;  %v5410_v6 = vsub.f32 %v5380_v12, %v297_v3  ;;  %v5412_v7 = vsub.f32 %v4500_v14, %v297_v3 }
 0x11a   :  { %v5414_v8 = vsub.f32 %v209_v23, %v297_v3  ;;  %v5416_v9 = vsub.f32 %v212_v28, %v297_v3  ;;  %v5418_v10 = vsub.f32 %v4503_v22, %v297_v3  ;;  %v5420_v11 = vsub.f32 %v4504_v26, %v297_v3 }
 0x11b   :  { %v5422_v16 = vsub.f32 %v225_v35, %v297_v3  ;;  %v5424_v17 = vsub.f32 %v228_v40, %v297_v3  ;;  %v5426_v13 = vsub.f32 %v4507_v34, %v297_v3  ;;  %v5428_v15 = vsub.f32 %v4508_v38, %v297_v3 }
 0x11c   :  { %v5430_v12 = vsub.f32 %v241_v47, %v297_v3  ;;  %v5432_v14 = vsub.f32 %v244_v52, %v297_v3  ;;  %v5434_v18 = vsub.f32 %v4511_v46, %v297_v3  ;;  %v5436_v19 = vsub.f32 %v4512_v50, %v297_v3 }
 0x11d   :  { %v314_v20 = vmul.f32 %v5405_v4, %v5405_v4  ;;  %v315_v21 = vmul.f32 %v5407_v5, %v5407_v5  ;;  %v316_v22 = vmul.f32 %v5410_v6, %v5410_v6  ;;  %v317_v23 = vmul.f32 %v5412_v7, %v5412_v7 }
 0x11e   :  { %v318_v24 = vmul.f32 %v5414_v8, %v5414_v8  ;;  %v319_v30 = vmul.f32 %v5416_v9, %v5416_v9  ;;  %v320_v34 = vmul.f32 %v5418_v10, %v5418_v10  ;;  %v321_v36 = vmul.f32 %v5420_v11, %v5420_v11 }
 0x11f   :  { %v330_v25 = vsel %vm258_vm2, %v314_v20, 0.0  ;;  %v331_v26 = vsel %vm258_vm2, %v315_v21, 0.0  ;;  %v333_v28 = vsel %vm258_vm2, %v316_v22, 0.0  ;;  %v335_v31 = vsel %vm258_vm2, %v317_v23, 0.0 }
 0x120   :  { %v332_v27 = vadd.f32 %v331_v26, %v330_v25  ;;  %v337_v32 = vsel %vm258_vm2, %v318_v24, 0.0  ;;  %v339_v37 = vsel %vm258_vm2, %v319_v30, 0.0  ;;  %v322_v39 = vmul.f32 %v5422_v16, %v5422_v16 }
 0x121   :  { %v341_v40 = vsel %vm258_vm2, %v320_v34, 0.0  ;;  %v323_v42 = vmul.f32 %v5424_v17, %v5424_v17  ;;  %v343_v43 = vsel %vm258_vm2, %v321_v36, 0.0  ;;  %v324_v45 = vmul.f32 %v5426_v13, %v5426_v13 }
 0x122   :  { %v334_v29 = vadd.f32 %v333_v28, %v332_v27  ;;  %v345_v46 = vsel %vm258_vm2, %v322_v39, 0.0  ;;  %v325_v48 = vmul.f32 %v5428_v15, %v5428_v15  ;;  %v326_v51 = vmul.f32 %v5430_v12, %v5430_v12 }
 0x123   :  { %v347_v49 = vsel %vm258_vm2, %v323_v42, 0.0  ;;  %v349_v52 = vsel %vm258_vm2, %v324_v45, 0.0  ;;  %v327_v54 = vmul.f32 %v5432_v14, %v5432_v14  ;;  %v328_v57 = vmul.f32 %v5434_v18, %v5434_v18 }
 0x124   :  { %v336_v33 = vadd.f32 %v335_v31, %v334_v29  ;;  %v351_v55 = vsel %vm258_vm2, %v325_v48, 0.0  ;;  %v353_v58 = vsel %vm258_vm2, %v326_v51, 0.0  ;;  %v329_v60 = vmul.f32 %v5436_v19, %v5436_v19 }
 0x125   :  { %v355_v61 = vsel %vm258_vm2, %v327_v54, 0.0  ;;  %v357_v63 = vsel %vm258_vm2, %v328_v57, 0.0 }
 0x126   :  { %v338_v35 = vadd.f32 %v337_v32, %v336_v33  ;;  %v359_v1 = vsel %vm258_vm2, %v329_v60, 0.0  ;;  %v4053_v32 = vld [vmem:[%s6256_s2] ss:$0 sm:$0xff] }
 0x128   :  { %v340_v38 = vadd.f32 %v339_v37, %v338_v35 }
 0x12a   :  { %v342_v41 = vadd.f32 %v341_v40, %v340_v38 }
 0x12c   :  { %v344_v44 = vadd.f32 %v343_v43, %v342_v41 }
 0x12e   :  { %v346_v47 = vadd.f32 %v345_v46, %v344_v44 }
 0x130   :  { %v348_v50 = vadd.f32 %v347_v49, %v346_v47 }
 0x132   :  { %v350_v53 = vadd.f32 %v349_v52, %v348_v50 }
 0x134   :  { %v352_v56 = vadd.f32 %v351_v55, %v350_v53 }
 0x136   :  { %v354_v59 = vadd.f32 %v353_v58, %v352_v56 }
 0x138   :  { %v356_v62 = vadd.f32 %v355_v61, %v354_v59 }
 0x13a   :  { %v358_v0 = vadd.f32 %v357_v63, %v356_v62 }
 0x13c   :  { %v360_v2 = vadd.f32 %v359_v1, %v358_v0 }
 0x13e   :  { %v361_v3 = vrot.slane %v360_v2, 4 }
 0x140   :  { %v362_v20 = vadd.f32 %v361_v3, %v360_v2 }
 0x142   :  { %v363_v21 = vrot.slane %v362_v20, 2 }
 0x144   :  { %v364_v22 = vadd.f32 %v363_v21, %v362_v20 }
 0x146   :  { %v365_v23 = vrot.slane %v364_v22, 1 }
 0x148   :  { %v366_v24 = vadd.f32 %v365_v23, %v364_v22 }
 0x14a   :  { %v367_v25 = vmul.f32 0.0078125, %v366_v24 }
 0x14c   :  { %v368_v26 = vadd.f32 1e-05, %v367_v25 }
 0x14e   :  { %5237 = vrsqrt.f32 %v368_v26 }
 0x158   :  { %v5238_v27 = vpop.eup %5237 }
 0x159   :  { %v370_v28 = vmul.f32 %v5238_v27, %v5405_v4  ;;  %v371_v29 = vmul.f32 %v5238_v27, %v5407_v5  ;;  %v372_v30 = vmul.f32 %v5238_v27, %v5410_v6  ;;  %v373_v31 = vmul.f32 %v5238_v27, %v5412_v7 }
 0x15a   :  { %v374_v33 = vmul.f32 %v5238_v27, %v5414_v8  ;;  %v375_v34 = vmul.f32 %v5238_v27, %v5416_v9  ;;  %v376_v35 = vmul.f32 %v5238_v27, %v5418_v10  ;;  %v377_v36 = vmul.f32 %v5238_v27, %v5420_v11 }
 0x15b   :  { %v378_v4 = vmul.f32 %v5238_v27, %v5422_v16  ;;  %v379_v5 = vmul.f32 %v5238_v27, %v5424_v17  ;;  %v380_v6 = vmul.f32 %v5238_v27, %v5426_v13  ;;  %v381_v7 = vmul.f32 %v5238_v27, %v5428_v15  ;;  %v4054_v16 = vld [vmem:[%s6256_s2 + $0x1] ss:$0 sm:$0xff] }
 0x15c   :  { %v382_v37 = vmul.f32 %v5238_v27, %v5430_v12  ;;  %v383_v38 = vmul.f32 %v5238_v27, %v5432_v14  ;;  %v384_v8 = vmul.f32 %v5238_v27, %v5434_v18  ;;  %v385_v9 = vmul.f32 %v5238_v27, %v5436_v19 }
 0x15d   :  { %v390_v39 = vmul.f32 %v4053_v32, %v370_v28  ;;  %v391_v10 = vmul.f32 %v4053_v32, %v371_v29  ;;  %v392_v40 = vmul.f32 %v4053_v32, %v372_v30  ;;  %v393_v11 = vmul.f32 %v4053_v32, %v373_v31 }
 0x15e   :  { %v394_v17 = vmul.f32 %v4053_v32, %v374_v33  ;;  %v395_v13 = vmul.f32 %v4053_v32, %v375_v34  ;;  %v396_v41 = vmul.f32 %v4053_v32, %v376_v35  ;;  %v397_v15 = vmul.f32 %v4053_v32, %v377_v36 }
 0x15f   :  { %v398_v42 = vmul.f32 %v4053_v32, %v378_v4  ;;  %v399_v12 = vmul.f32 %v4053_v32, %v379_v5  ;;  %v400_v43 = vmul.f32 %v4053_v32, %v380_v6  ;;  %v401_v14 = vmul.f32 %v4053_v32, %v381_v7  ;;  %v5150_v5 = vld [vmem:[%s6255_s4 + $0x20] sm:$0xff]   ;;  %v5148_v6 = vld [vmem:[%s6254_s3 + $0x8] sm:$0xff]  }
 0x160   :  { %v402_v44 = vmul.f32 %v4053_v32, %v382_v37  ;;  %v403_v18 = vmul.f32 %v4053_v32, %v383_v38  ;;  %v404_v45 = vmul.f32 %v4053_v32, %v384_v8  ;;  %v405_v19 = vmul.f32 %v4053_v32, %v385_v9  ;;  %v5149_v7 = vld [vmem:[%s6254_s3 + $0x28] sm:$0xff]   ;;  %v5152_v38 = vld [vmem:[%s6254_s3 + $0x10] sm:$0xff]   ;;  %v5153_v8 = vld [vmem:[%s6254_s3 + $0x18] sm:$0xff]  }
 0x161   :  { %v410_v46 = vadd.f32 %v4054_v16, %v390_v39  ;;  %v411_v47 = vadd.f32 %v4054_v16, %v391_v10  ;;  %v412_v48 = vadd.f32 %v4054_v16, %v392_v40  ;;  %v413_v49 = vadd.f32 %v4054_v16, %v393_v11  ;;  %v5151_v37 = vld [vmem:[%s6255_s4 + $0x28] sm:$0xff]   ;;  %v5154_v9 = vld [vmem:[%s6255_s4 + $0x10] sm:$0xff]   ;;  %v5155_v39 = vld [vmem:[%s6255_s4 + $0x18] sm:$0xff]  }
 0x162   :  { %v414_v50 = vadd.f32 %v4054_v16, %v394_v17  ;;  %v415_v51 = vadd.f32 %v4054_v16, %v395_v13  ;;  %v416_v52 = vadd.f32 %v4054_v16, %v396_v41  ;;  %v417_v53 = vadd.f32 %v4054_v16, %v397_v15  ;;  %v5156_v10 = vld [vmem:[%s6255_s4] sm:$0xff]  }
 0x163   :  { %v418_v54 = vadd.f32 %v4054_v16, %v398_v42  ;;  %v419_v55 = vadd.f32 %v4054_v16, %v399_v12  ;;  %v420_v56 = vadd.f32 %v4054_v16, %v400_v43  ;;  %v421_v57 = vadd.f32 %v4054_v16, %v401_v14 }
 0x164   :  { %v422_v58 = vadd.f32 %v4054_v16, %v402_v44  ;;  %v423_v59 = vadd.f32 %v4054_v16, %v403_v18  ;;  %v424_v60 = vadd.f32 %v4054_v16, %v404_v45  ;;  %v425_v61 = vadd.f32 %v4054_v16, %v405_v19  ;;  %v5157_v18 = vld [vmem:[%s6254_s3 + $0x40] sm:$0xff]  }
 0x165   :  { %v426_v62 = vmax.f32 %v410_v46, 0.0  ;;  %v427_v63 = vmax.f32 %v411_v47, 0.0  ;;  %v428_v0 = vmax.f32 %v412_v48, 0.0  ;;  %v429_v1 = vmax.f32 %v413_v49, 0.0  ;;  %v5158_v49 = vld [vmem:[%s6254_s3 + $0x48] sm:$0xff]  }
 0x166   :  { %v430_v2 = vmax.f32 %v414_v50, 0.0  ;;  %v431_v3 = vmax.f32 %v415_v51, 0.0  ;;  %v432_v20 = vmax.f32 %v416_v52, 0.0  ;;  %v433_v21 = vmax.f32 %v417_v53, 0.0  ;;  %v5159_v51 = vld [vmem:[%s6255_s4 + $0x8] sm:$0xff]   ;;  %v5160_v52 = vld [vmem:[%s6254_s3 + $0x60] sm:$0xff]  }
 0x167   :  { %v434_v22 = vmax.f32 %v418_v54, 0.0  ;;  %v435_v23 = vmax.f32 %v419_v55, 0.0  ;;  %v436_v24 = vmax.f32 %v420_v56, 0.0  ;;  %v437_v25 = vmax.f32 %v421_v57, 0.0  ;;  %v5162_v53 = vld [vmem:[%s6254_s3 + $0x30] sm:$0xff]   ;;  %v5161_v54 = vld [vmem:[%s6254_s3 + $0x68] sm:$0xff]  }
 0x168   :  { %v438_v26 = vmax.f32 %v422_v58, 0.0  ;;  %v439_v27 = vmax.f32 %v423_v59, 0.0  ;;  %v440_v28 = vmax.f32 %v424_v60, 0.0  ;;  %v441_v29 = vmax.f32 %v425_v61, 0.0  ;;  %v5163_v55 = vld [vmem:[%s6254_s3 + $0x38] sm:$0xff]   ;;  %v5164_v56 = vld [vmem:[%s6255_s4 + $0x30] sm:$0xff]  }
 0x169   :  { %v5508_v30 = vpack.c.bf16 %v427_v63, %v426_v62  ;;  %v5510_v31 = vpack.c.bf16 %v429_v1, %v428_v0  ;;  %v5512_v32 = vpack.c.bf16 %v431_v3, %v430_v2  ;;  %v5514_v33 = vpack.c.bf16 %v433_v21, %v432_v20  ;;  %v5165_v57 = vld [vmem:[%s6255_s4 + $0x38] sm:$0xff]   ;;  %v5166_v58 = vld [vmem:[%s6255_s4 + $0x40] sm:$0xff]   ;;  %v5170_v59 = vld [vmem:[%s6254_s3 + $0x70] sm:$0xff]  }
 0x16a   :  { %v5516_v34 = vpack.c.bf16 %v435_v23, %v434_v22  ;;  %v5518_v35 = vpack.c.bf16 %v437_v25, %v436_v24  ;;  %v5520_v36 = vpack.c.bf16 %v439_v27, %v438_v26  ;;  %v5522_v4 = vpack.c.bf16 %v441_v29, %v440_v28  ;;  %v5171_v60 = vld [vmem:[%s6254_s3 + $0x78] sm:$0xff]  }
 0x16b   :  { %4513 = vmatprep.subr.bf16.mxu1 %v5508_v30  ;;  %4569 = vmatprep.subr.bf16.mxu0 %v5508_v30 }
 0x16c   :  { %4514 = vmatpush3.bf16.msra.mxu1 %v5508_v30  ;;  %4570 = vmatpush3.bf16.msra.mxu0 %v5508_v30 }
 0x16d   :  { %4515 = vmatprep.subr.bf16.mxu1 %v5510_v31  ;;  %4571 = vmatprep.subr.bf16.mxu0 %v5510_v31 }
 0x170   :  { %4516 = vmatpush3.bf16.msra.mxu1 %v5510_v31  ;;  %4572 = vmatpush3.bf16.msra.mxu0 %v5510_v31 }
 0x171   :  { %4517 = vmatprep.subr.bf16.mxu1 %v5512_v32  ;;  %4573 = vmatprep.subr.bf16.mxu0 %v5512_v32 }
 0x174   :  { %4518 = vmatpush3.bf16.msra.mxu1 %v5512_v32  ;;  %4574 = vmatpush3.bf16.msra.mxu0 %v5512_v32 }
 0x175   :  { %4519 = vmatprep.subr.bf16.mxu1 %v5514_v33  ;;  %4575 = vmatprep.subr.bf16.mxu0 %v5514_v33 }
 0x178   :  { %4520 = vmatpush3.bf16.msra.mxu1 %v5514_v33  ;;  %4576 = vmatpush3.bf16.msra.mxu0 %v5514_v33 }
 0x179   :  { %4521 = vmatprep.subr.bf16.mxu1 %v5516_v34  ;;  %4577 = vmatprep.subr.bf16.mxu0 %v5516_v34 }
 0x17c   :  { %4522 = vmatpush3.bf16.msra.mxu1 %v5516_v34  ;;  %4578 = vmatpush3.bf16.msra.mxu0 %v5516_v34 }
 0x17d   :  { %4523 = vmatprep.subr.bf16.mxu1 %v5518_v35  ;;  %4579 = vmatprep.subr.bf16.mxu0 %v5518_v35 }
 0x180   :  { %4524 = vmatpush3.bf16.msra.mxu1 %v5518_v35  ;;  %4580 = vmatpush3.bf16.msra.mxu0 %v5518_v35 }
 0x181   :  { %4525 = vmatprep.subr.bf16.mxu1 %v5520_v36  ;;  %4581 = vmatprep.subr.bf16.mxu0 %v5520_v36 }
 0x184   :  { %4526 = vmatpush3.bf16.msra.mxu1 %v5520_v36  ;;  %4582 = vmatpush3.bf16.msra.mxu0 %v5520_v36 }
 0x185   :  { %4527 = vmatprep.subr.bf16.mxu1 %v5522_v4  ;;  %4583 = vmatprep.subr.bf16.mxu0 %v5522_v4 }
 0x188   :  { %4528 = vmatpush3.bf16.msra.mxu1 %v5522_v4  ;;  %4584 = vmatpush3.bf16.msra.mxu0 %v5522_v4 }
 0x189   :  { %4533 = vmatprep.subr.bf16.mxu1 %v5508_v30  ;;  %4589 = vmatprep.subr.bf16.mxu0 %v5150_v5 }
 0x18b   :  { %4530 = vmatmul.mubr.bf16.vlgmr.msra.gmra.mrb[0].mxu1 %v5148_v6  ;;  %4586 = vmatmul.mubr.bf16.vlgmr.msra.gmra.mrb[16].mxu0 %v5149_v7 }
 0x18c   :  { %4534 = vmatpush3.bf16.msra.mxu1 %v5508_v30  ;;  %4590 = vmatpush3.bf16.msra.mxu0 %v5150_v5 }
 0x18d   :  { %4535 = vmatprep.subr.bf16.mxu1 %v5510_v31  ;;  %4591 = vmatprep.subr.bf16.mxu0 %v5151_v37 }
 0x18e   :  { %4549 = vmatprep.mubr.bf16.mxu1 %v5152_v38 }
 0x190   :  { %4536 = vmatpush3.bf16.msra.mxu1 %v5510_v31  ;;  %4592 = vmatpush3.bf16.msra.mxu0 %v5151_v37 }
 0x191   :  { %4537 = vmatprep.subr.bf16.mxu1 %v5512_v32  ;;  %4625 = vmatprep.subr.bf16.mxu0 %v5508_v30 }
 0x194   :  { %4538 = vmatpush3.bf16.msra.mxu1 %v5512_v32 }
 0x195   :  { %4539 = vmatprep.subr.bf16.mxu1 %v5514_v33 }
 0x198   :  { %4540 = vmatpush3.bf16.msra.mxu1 %v5514_v33 }
 0x199   :  { %4541 = vmatprep.subr.bf16.mxu1 %v5516_v34 }
 0x19c   :  { %4542 = vmatpush3.bf16.msra.mxu1 %v5516_v34 }
 0x19d   :  { %4543 = vmatprep.subr.bf16.mxu1 %v5518_v35 }
 0x1a0   :  { %4544 = vmatpush3.bf16.msra.mxu1 %v5518_v35 }
 0x1a1   :  { %4545 = vmatprep.subr.bf16.mxu1 %v5520_v36 }
 0x1a4   :  { %4546 = vmatpush3.bf16.msra.mxu1 %v5520_v36 }
 0x1a5   :  { %4547 = vmatprep.subr.bf16.mxu1 %v5522_v4 }
 0x1a8   :  { %4548 = vmatpush3.bf16.msra.mxu1 %v5522_v4 }
 0x1a9   :  { %4553 = vmatprep.subr.bf16.mxu1 %v5154_v9 }
 0x1ab   :  { %4550 = vmatmul.mubr.bf16.vlgmr.msra.gmra.mrb[4].mxu1 %v5153_v8 }
 0x1ac   :  { %4554 = vmatpush3.bf16.msra.mxu1 %v5154_v9 }
 0x1ad   :  { %4555 = vmatprep.subr.bf16.mxu1 %v5155_v39 }
 0x1b0   :  { %4556 = vmatpush3.bf16.msra.mxu1 %v5155_v39 }
 0x1b1   :  { %4561 = vmatprep.subr.bf16.mxu1 %v5156_v10 }
 0x25e   :  { %v4531_v40 = vpop.f32.mrb[0].mxu1  ;;  %v4587_v11 = vpop.f32.mrb[16].mxu0 }
 0x25f   :  { %v536_v16 = vpop.f32.mrb[1].mxu1  ;;  %v806_v17 = vpop.f32.mrb[17].mxu0 }
 0x260   :  { %v4532_v13 = vpop.f32.mrb[2].mxu1  ;;  %v4588_v41 = vpop.f32.mrb[18].mxu0 }
 0x261   :  { %v552_v15 = vpack.c.bf16 %v4532_v13, %v4531_v40  ;;  %v822_v42 = vpack.c.bf16 %v4588_v41, %v4587_v11  ;;  %v539_v12 = vpop.f32.mrb[3].mxu1  ;;  %v809_v43 = vpop.f32.mrb[19].mxu0  ;;  %v5167_v13 = vld [vmem:[%s6255_s4 + $0x48] sm:$0xff]   ;;  %v5168_v41 = vld [vmem:[%s6254_s3 + $0x50] sm:$0xff]  }
 0x262   :  { %v551_v14 = vpack.c.bf16 %v539_v12, %v536_v16  ;;  %v821_v44 = vpack.c.bf16 %v809_v43, %v806_v17  ;;  %v5173_v12 = vld [vmem:[%s6255_s4 + $0x58] sm:$0xff]   ;;  %v5174_v43 = vld [vmem:[%s6255_s4 + $0x60] sm:$0xff]  }
 0x264   :  { %4593 = vmatprep.mubr.msk.bf16.mxu0 %vm258_vm2, %v821_v44 }
 0x265   :  { %4594 = vmatmul.mubr.msk.bf16.vlgmr.msra.gmra.mrb[20].mxu0 %vm258_vm2, %v822_v42  ;;  %v5169_v42 = vld [vmem:[%s6254_s3 + $0x58] sm:$0xff]  }
 0x266   :  { %4626 = vmatpush3.bf16.msra.mxu0 %v5508_v30  ;;  %4641 = vmatprep.mubr.bf16.mxu0 %v5157_v18 }
 0x267   :  { %4627 = vmatprep.subr.bf16.mxu0 %v5510_v31 }
 0x26a   :  { %4628 = vmatpush3.bf16.msra.mxu0 %v5510_v31 }
 0x26b   :  { %4629 = vmatprep.subr.bf16.mxu0 %v5512_v32 }
 0x26e   :  { %4630 = vmatpush3.bf16.msra.mxu0 %v5512_v32 }
 0x26f   :  { %4631 = vmatprep.subr.bf16.mxu0 %v5514_v33 }
 0x272   :  { %4632 = vmatpush3.bf16.msra.mxu0 %v5514_v33 }
 0x273   :  { %4633 = vmatprep.subr.bf16.mxu0 %v5516_v34 }
 0x276   :  { %4634 = vmatpush3.bf16.msra.mxu0 %v5516_v34 }
 0x277   :  { %4635 = vmatprep.subr.bf16.mxu0 %v5518_v35 }
 0x27a   :  { %4636 = vmatpush3.bf16.msra.mxu0 %v5518_v35 }
 0x27b   :  { %4637 = vmatprep.subr.bf16.mxu0 %v5520_v36 }
 0x27e   :  { %4638 = vmatpush3.bf16.msra.mxu0 %v5520_v36  ;;  %v4551_v45 = vpop.f32.mrb[4].mxu1 }
 0x27f   :  { %4639 = vmatprep.subr.bf16.mxu0 %v5522_v4  ;;  %v604_v19 = vpop.f32.mrb[5].mxu1 }
 0x280   :  { %v4552_v46 = vpop.f32.mrb[6].mxu1 }
 0x281   :  { %v620_v47 = vpack.c.bf16 %v4552_v46, %v4551_v45  ;;  %v607_v48 = vpop.f32.mrb[7].mxu1 }
 0x282   :  { %v619_v50 = vpack.c.bf16 %v607_v48, %v604_v19  ;;  %4640 = vmatpush3.bf16.msra.mxu0 %v5522_v4 }
 0x283   :  { %4681 = vmatprep.subr.bf16.mxu0 %v5508_v30 }
 0x284   :  { %4557 = vmatprep.mubr.msk.bf16.mxu1 %vm258_vm2, %v619_v50 }
 0x285   :  { %4558 = vmatmul.mubr.msk.bf16.vlgmr.msra.gmra.mrb[8].mxu1 %vm258_vm2, %v620_v47  ;;  %4642 = vmatmul.mubr.bf16.vlgmr.msra.gmra.mrb[24].mxu0 %v5158_v49 }
 0x286   :  { %4562 = vmatpush3.bf16.msra.mxu1 %v5156_v10  ;;  %4682 = vmatpush3.bf16.msra.mxu0 %v5508_v30 }
 0x287   :  { %4565 = vmatprep.mubr.msk.bf16.mxu1 %vm258_vm2, %v551_v14  ;;  %4683 = vmatprep.subr.bf16.mxu0 %v5510_v31 }
 0x288   :  { %4563 = vmatprep.subr.bf16.mxu1 %v5159_v51  ;;  %4697 = vmatprep.mubr.bf16.mxu0 %v5160_v52 }
 0x28a   :  { %4564 = vmatpush3.bf16.msra.mxu1 %v5159_v51  ;;  %4684 = vmatpush3.bf16.msra.mxu0 %v5510_v31 }
 0x28b   :  { %4597 = vmatprep.subr.bf16.mxu1 %v5508_v30  ;;  %4685 = vmatprep.subr.bf16.mxu0 %v5512_v32 }
 0x28e   :  { %4686 = vmatpush3.bf16.msra.mxu0 %v5512_v32 }
 0x28f   :  { %4687 = vmatprep.subr.bf16.mxu0 %v5514_v33 }
 0x291   :  { %4566 = vmatmul.mubr.msk.bf16.vlgmr.msra.gmra.mrb[8].mxu1 %vm258_vm2, %v552_v15  ;;  %v5172_v15 = vld [vmem:[%s6255_s4 + $0x50] sm:$0xff]  }
 0x292   :  { %4598 = vmatpush3.bf16.msra.mxu1 %v5508_v30  ;;  %4688 = vmatpush3.bf16.msra.mxu0 %v5514_v33 }
 0x293   :  { %4599 = vmatprep.subr.bf16.mxu1 %v5510_v31  ;;  %4689 = vmatprep.subr.bf16.mxu0 %v5516_v34 }
 0x294   :  { %4613 = vmatprep.mubr.bf16.mxu1 %v5162_v53  ;;  %v5175_v53 = vld [vmem:[%s6255_s4 + $0x68] sm:$0xff]  }
 0x296   :  { %4600 = vmatpush3.bf16.msra.mxu1 %v5510_v31  ;;  %4690 = vmatpush3.bf16.msra.mxu0 %v5516_v34 }
 0x297   :  { %4601 = vmatprep.subr.bf16.mxu1 %v5512_v32  ;;  %4691 = vmatprep.subr.bf16.mxu0 %v5518_v35 }
 0x29a   :  { %4602 = vmatpush3.bf16.msra.mxu1 %v5512_v32  ;;  %4692 = vmatpush3.bf16.msra.mxu0 %v5518_v35 }
 0x29b   :  { %4603 = vmatprep.subr.bf16.mxu1 %v5514_v33  ;;  %4693 = vmatprep.subr.bf16.mxu0 %v5520_v36 }
 0x29e   :  { %4604 = vmatpush3.bf16.msra.mxu1 %v5514_v33  ;;  %4694 = vmatpush3.bf16.msra.mxu0 %v5520_v36 }
 0x29f   :  { %4605 = vmatprep.subr.bf16.mxu1 %v5516_v34  ;;  %4695 = vmatprep.subr.bf16.mxu0 %v5522_v4 }
 0x2a2   :  { %4606 = vmatpush3.bf16.msra.mxu1 %v5516_v34  ;;  %4696 = vmatpush3.bf16.msra.mxu0 %v5522_v4 }
 0x2a3   :  { %4607 = vmatprep.subr.bf16.mxu1 %v5518_v35  ;;  %4709 = vmatprep.subr.bf16.mxu0 %v5508_v30 }
 0x2a5   :  { %4698 = vmatmul.mubr.bf16.vlgmr.msra.gmra.mrb[28].mxu0 %v5161_v54  ;;  %v5176_v54 = vld [vmem:[%s6255_s4 + $0x70] sm:$0xff]  }
 0x2a6   :  { %4608 = vmatpush3.bf16.msra.mxu1 %v5518_v35  ;;  %4710 = vmatpush3.bf16.msra.mxu0 %v5508_v30 }
 0x2a7   :  { %4609 = vmatprep.subr.bf16.mxu1 %v5520_v36  ;;  %4711 = vmatprep.subr.bf16.mxu0 %v5510_v31 }
 0x2a8   :  { %4725 = vmatprep.mubr.bf16.mxu0 %v5170_v59 }
 0x2aa   :  { %4610 = vmatpush3.bf16.msra.mxu1 %v5520_v36  ;;  %4712 = vmatpush3.bf16.msra.mxu0 %v5510_v31 }
 0x2ab   :  { %4611 = vmatprep.subr.bf16.mxu1 %v5522_v4  ;;  %4713 = vmatprep.subr.bf16.mxu0 %v5512_v32 }
 0x2ae   :  { %4612 = vmatpush3.bf16.msra.mxu1 %v5522_v4  ;;  %4714 = vmatpush3.bf16.msra.mxu0 %v5512_v32 }
 0x2af   :  { %4715 = vmatprep.subr.bf16.mxu0 %v5514_v33  ;;  %4617 = vmatprep.subr.bf16.mxu1 %v5164_v56 }
 0x2b1   :  { %4614 = vmatmul.mubr.bf16.vlgmr.msra.gmra.mrb[12].mxu1 %v5163_v55  ;;  %v5177_v55 = vld [vmem:[%s6255_s4 + $0x78] sm:$0xff]  }
 0x2b2   :  { %4716 = vmatpush3.bf16.msra.mxu0 %v5514_v33  ;;  %4618 = vmatpush3.bf16.msra.mxu1 %v5164_v56  ;;  %v5178_v56 = vld [vmem:[%s6254_s3 + $0x80] sm:$0xff]  }
 0x2b3   :  { %4717 = vmatprep.subr.bf16.mxu0 %v5516_v34  ;;  %4619 = vmatprep.subr.bf16.mxu1 %v5165_v57 }
 0x2b6   :  { %4718 = vmatpush3.bf16.msra.mxu0 %v5516_v34  ;;  %4620 = vmatpush3.bf16.msra.mxu1 %v5165_v57 }
 0x2b7   :  { %4719 = vmatprep.subr.bf16.mxu0 %v5518_v35  ;;  %4645 = vmatprep.subr.bf16.mxu1 %v5166_v58 }
 0x2ba   :  { %4720 = vmatpush3.bf16.msra.mxu0 %v5518_v35 }
 0x2bb   :  { %4721 = vmatprep.subr.bf16.mxu0 %v5520_v36 }
 0x2be   :  { %4722 = vmatpush3.bf16.msra.mxu0 %v5520_v36 }
 0x2bf   :  { %4723 = vmatprep.subr.bf16.mxu0 %v5522_v4 }
 0x2c2   :  { %4724 = vmatpush3.bf16.msra.mxu0 %v5522_v4 }
 0x2c5   :  { %4726 = vmatmul.mubr.bf16.vlgmr.msra.gmra.mrb[32].mxu0 %v5171_v60 }
 0x338   :  { %v4595_v61 = vpop.f32.mrb[20].mxu0 }
 0x339   :  { %v875_v62 = vpop.f32.mrb[21].mxu0 }
 0x33a   :  { %v4596_v63 = vpop.f32.mrb[22].mxu0 }
 0x33b   :  { %v878_v0 = vpop.f32.mrb[23].mxu0 }
 0x358   :  { %v4643_v1 = vpop.f32.mrb[24].mxu0 }
 0x359   :  { %v1084_v2 = vpop.f32.mrb[25].mxu0 }
 0x35a   :  { %v4644_v3 = vpop.f32.mrb[26].mxu0 }
 0x35b   :  { %v1100_v20 = vpack.c.bf16 %v4644_v3, %v4643_v1  ;;  %v1087_v21 = vpop.f32.mrb[27].mxu0 }
 0x35c   :  { %v1099_v22 = vpack.c.bf16 %v1087_v21, %v1084_v2 }
 0x364   :  { %v4567_v23 = vpop.f32.mrb[8].mxu1 }
 0x365   :  { %v5705_v24 = vadd.f32 %v4595_v61, %v4567_v23  ;;  %v740_v25 = vpop.f32.mrb[9].mxu1 }
 0x366   :  { %v5707_v26 = vadd.f32 %v875_v62, %v740_v25  ;;  %v4568_v27 = vpop.f32.mrb[10].mxu1 }
 0x367   :  { %v5709_v28 = vadd.f32 %v4596_v63, %v4568_v27  ;;  %v743_v29 = vpop.f32.mrb[11].mxu1 }
 0x368   :  { %v5711_v5 = vadd.f32 %v878_v0, %v743_v29 }
 0x378   :  { %v5713_v6 = vpop.f32.mrb[28].mxu0 }
 0x379   :  { %v5715_v7 = vpop.f32.mrb[29].mxu0 }
 0x37a   :  { %v5717_v37 = vpop.f32.mrb[30].mxu0 }
 0x37b   :  { %v1378_v38 = vpack.c.bf16 %v5717_v37, %v5713_v6  ;;  %v1365_v8 = vpop.f32.mrb[31].mxu0 }
 0x37c   :  { %v1377_v9 = vpack.c.bf16 %v1365_v8, %v5715_v7 }
 0x384   :  { %v4615_v39 = vpop.f32.mrb[12].mxu1 }
 0x385   :  { %v945_v10 = vpop.f32.mrb[13].mxu1 }
 0x386   :  { %v4616_v40 = vpop.f32.mrb[14].mxu1 }
 0x387   :  { %v961_v11 = vpack.c.bf16 %v4616_v40, %v4615_v39  ;;  %v948_v16 = vpop.f32.mrb[15].mxu1 }
 0x388   :  { %v960_v17 = vpack.c.bf16 %v948_v16, %v945_v10 }
 0x38a   :  { %4621 = vmatprep.mubr.msk.bf16.mxu1 %vm258_vm2, %v960_v17 }
 0x38b   :  { %4622 = vmatmul.mubr.msk.bf16.vlgmr.msra.gmra.mrb[16].mxu1 %vm258_vm2, %v961_v11 }
 0x38c   :  { %4646 = vmatpush3.bf16.msra.mxu1 %v5166_v58  ;;  %4649 = vmatprep.mubr.msk.bf16.mxu1 %vm258_vm2, %v1099_v22 }
 0x38d   :  { %4647 = vmatprep.subr.bf16.mxu1 %v5167_v13 }
 0x390   :  { %4648 = vmatpush3.bf16.msra.mxu1 %v5167_v13 }
 0x391   :  { %4653 = vmatprep.subr.bf16.mxu1 %v5508_v30 }
 0x397   :  { %4650 = vmatmul.mubr.msk.bf16.vlgmr.msra.gmra.mrb[16].mxu1 %vm258_vm2, %v1100_v20 }
 0x398   :  { %4654 = vmatpush3.bf16.msra.mxu1 %v5508_v30  ;;  %4669 = vmatprep.mubr.bf16.mxu1 %v5168_v41  ;;  %v4727_v14 = vpop.f32.mrb[32].mxu0 }
 0x399   :  { %4655 = vmatprep.subr.bf16.mxu1 %v5510_v31  ;;  %v1501_v44 = vpop.f32.mrb[33].mxu0 }
 0x39a   :  { %v4728_v18 = vpop.f32.mrb[34].mxu0 }
 0x39b   :  { %v1517_v45 = vpack.c.bf16 %v4728_v18, %v4727_v14  ;;  %v1504_v19 = vpop.f32.mrb[35].mxu0 }
 0x39c   :  { %4656 = vmatpush3.bf16.msra.mxu1 %v5510_v31  ;;  %v1516_v46 = vpack.c.bf16 %v1504_v19, %v1501_v44 }
 0x39d   :  { %4657 = vmatprep.subr.bf16.mxu1 %v5512_v32 }
 0x3a0   :  { %4658 = vmatpush3.bf16.msra.mxu1 %v5512_v32 }
 0x3a1   :  { %4659 = vmatprep.subr.bf16.mxu1 %v5514_v33 }
 0x3a4   :  { %4660 = vmatpush3.bf16.msra.mxu1 %v5514_v33 }
 0x3a5   :  { %4661 = vmatprep.subr.bf16.mxu1 %v5516_v34 }
 0x3a8   :  { %4662 = vmatpush3.bf16.msra.mxu1 %v5516_v34 }
 0x3a9   :  { %4663 = vmatprep.subr.bf16.mxu1 %v5518_v35 }
 0x3ac   :  { %4664 = vmatpush3.bf16.msra.mxu1 %v5518_v35 }
 0x3ad   :  { %4665 = vmatprep.subr.bf16.mxu1 %v5520_v36 }
 0x3b0   :  { %4666 = vmatpush3.bf16.msra.mxu1 %v5520_v36 }
 0x3b1   :  { %4667 = vmatprep.subr.bf16.mxu1 %v5522_v4 }
 0x3b4   :  { %4668 = vmatpush3.bf16.msra.mxu1 %v5522_v4 }
 0x3b5   :  { %4673 = vmatprep.subr.bf16.mxu1 %v5172_v15 }
 0x3b7   :  { %4670 = vmatmul.mubr.bf16.vlgmr.msra.gmra.mrb[20].mxu1 %v5169_v42 }
 0x3b8   :  { %4674 = vmatpush3.bf16.msra.mxu1 %v5172_v15 }
 0x3b9   :  { %4675 = vmatprep.subr.bf16.mxu1 %v5173_v12 }
 0x3bc   :  { %4676 = vmatpush3.bf16.msra.mxu1 %v5173_v12 }
 0x3bd   :  { %4701 = vmatprep.subr.bf16.mxu1 %v5174_v43 }
 0x48a   :  { %v4671_v47 = vpop.f32.mrb[20].mxu1 }
 0x48b   :  { %v1223_v48 = vpop.f32.mrb[21].mxu1 }
 0x48c   :  { %v4672_v49 = vpop.f32.mrb[22].mxu1 }
 0x48d   :  { %v1239_v50 = vpack.c.bf16 %v4672_v49, %v4671_v47  ;;  %v1226_v51 = vpop.f32.mrb[23].mxu1  ;;  %v4141_v49 = vld [vmem:[%s6257_s5] ss:$0 sm:$0xff] }
 0x48e   :  { %v1238_v52 = vpack.c.bf16 %v1226_v51, %v1223_v48 }
 0x490   :  { %4677 = vmatprep.mubr.msk.bf16.mxu1 %vm258_vm2, %v1238_v52 }
 0x491   :  { %4678 = vmatmul.mubr.msk.bf16.vlgmr.msra.gmra.mrb[16].mxu1 %vm258_vm2, %v1239_v50 }
 0x492   :  { %4705 = vmatprep.mubr.msk.bf16.mxu1 %vm258_vm2, %v1377_v9  ;;  %4702 = vmatpush3.bf16.msra.mxu1 %v5174_v43 }
 0x493   :  { %4703 = vmatprep.subr.bf16.mxu1 %v5175_v53 }
 0x496   :  { %4704 = vmatpush3.bf16.msra.mxu1 %v5175_v53 }
 0x497   :  { %4729 = vmatprep.subr.bf16.mxu1 %v5176_v54 }
 0x49d   :  { %4706 = vmatmul.mubr.msk.bf16.vlgmr.msra.gmra.mrb[16].mxu1 %vm258_vm2, %v1378_v38 }
 0x49e   :  { %4730 = vmatpush3.bf16.msra.mxu1 %v5176_v54  ;;  %4733 = vmatprep.mubr.msk.bf16.mxu1 %vm258_vm2, %v1516_v46  ;;  %v4142_v54 = vld [vmem:[%s6257_s5 + $0x1] ss:$0 sm:$0xff] }
 0x49f   :  { %4731 = vmatprep.subr.bf16.mxu1 %v5177_v55 }
 0x4a2   :  { %4732 = vmatpush3.bf16.msra.mxu1 %v5177_v55 }
 0x4a3   :  { %4737 = vmatprep.subr.bf16.mxu1 %v5508_v30 }
 0x4a9   :  { %4734 = vmatmul.mubr.msk.bf16.vlgmr.msra.gmra.mrb[16].mxu1 %vm258_vm2, %v1517_v45 }
 0x4aa   :  { %4738 = vmatpush3.bf16.msra.mxu1 %v5508_v30  ;;  %4753 = vmatprep.mubr.bf16.mxu1 %v5178_v56  ;;  %v5180_v30 = vld [vmem:[%s6255_s4 + $0x80] sm:$0xff]  }
 0x4ab   :  { %4739 = vmatprep.subr.bf16.mxu1 %v5510_v31 }
 0x4ae   :  { %4740 = vmatpush3.bf16.msra.mxu1 %v5510_v31  ;;  %v5179_v31 = vld [vmem:[%s6254_s3 + $0x88] sm:$0xff]  }
 0x4af   :  { %4741 = vmatprep.subr.bf16.mxu1 %v5512_v32 }
 0x4b2   :  { %4742 = vmatpush3.bf16.msra.mxu1 %v5512_v32  ;;  %v5181_v32 = vld [vmem:[%s6255_s4 + $0x88] sm:$0xff]  }
 0x4b3   :  { %4743 = vmatprep.subr.bf16.mxu1 %v5514_v33 }
 0x4b6   :  { %4744 = vmatpush3.bf16.msra.mxu1 %v5514_v33 }
 0x4b7   :  { %4745 = vmatprep.subr.bf16.mxu1 %v5516_v34 }
 0x4ba   :  { %4746 = vmatpush3.bf16.msra.mxu1 %v5516_v34 }
 0x4bb   :  { %4747 = vmatprep.subr.bf16.mxu1 %v5518_v35 }
 0x4be   :  { %4748 = vmatpush3.bf16.msra.mxu1 %v5518_v35 }
 0x4bf   :  { %4749 = vmatprep.subr.bf16.mxu1 %v5520_v36 }
 0x4c2   :  { %4750 = vmatpush3.bf16.msra.mxu1 %v5520_v36 }
 0x4c3   :  { %4751 = vmatprep.subr.bf16.mxu1 %v5522_v4 }
 0x4c6   :  { %4752 = vmatpush3.bf16.msra.mxu1 %v5522_v4  ;;  %v5249_v4 = vmov 0.0  }
 0x4c7   :  { %4757 = vmatprep.subr.bf16.mxu1 %v5180_v30  ;;  %4765 = vmatprep.subr.bf16.mxu0 %v5249_v4 }
 0x4c8   :  { %4769 = vmatprep.mubr.msk.bf16.mxu0 %vm5250_vm3, %v5249_v4 }
 0x4c9   :  { %4754 = vmatmul.mubr.bf16.vlgmr.msra.gmra.mrb[24].mxu1 %v5179_v31 }
 0x4ca   :  { %4758 = vmatpush3.bf16.msra.mxu1 %v5180_v30 }
 0x4cb   :  { %4759 = vmatprep.subr.bf16.mxu1 %v5181_v32 }
 0x4ce   :  { %4760 = vmatpush3.bf16.msra.mxu1 %v5181_v32 }
 0x4cf   :  { %4797 = vmatprep.subr.bf16.mxu1 %v5249_v4 }
 0x59c   :  { %v4755_v33 = vpop.f32.mrb[24].mxu1 }
 0x59d   :  { %v1640_v34 = vpop.f32.mrb[25].mxu1 }
 0x59e   :  { %v4756_v35 = vpop.f32.mrb[26].mxu1 }
 0x59f   :  { %v1656_v36 = vpack.c.bf16 %v4756_v35, %v4755_v33  ;;  %v1643_v57 = vpop.f32.mrb[27].mxu1 }
 0x5a0   :  { %v1655_v58 = vpack.c.bf16 %v1643_v57, %v1640_v34 }
 0x5a2   :  { %4761 = vmatprep.mubr.msk.bf16.mxu1 %vm258_vm2, %v1655_v58 }
 0x5a3   :  { %4762 = vmatmul.mubr.msk.bf16.vlgmr.msra.gmra.mrb[16].mxu1 %vm258_vm2, %v1656_v36 }
 0x5a4   :  { %4801 = vmatprep.mubr.msk.bf16.mxu1 %vm5250_vm3, %v5249_v4 }
 0x676   :  { %v4763_v59 = vpop.f32.mrb[16].mxu1 }
 0x677   :  { %v5036_v60 = vadd.f32 %v5705_v24, %v4763_v59  ;;  %v1709_v61 = vpop.f32.mrb[17].mxu1 }
 0x678   :  { %v5038_v62 = vadd.f32 %v5707_v26, %v1709_v61  ;;  %v4764_v63 = vpop.f32.mrb[18].mxu1 }
 0x679   :  { %v5040_v0 = vadd.f32 %v5709_v28, %v4764_v63  ;;  %v1712_v1 = vpop.f32.mrb[19].mxu1  ;;  %v1733_v22 = vsel %vm258_vm2, %v5036_v60, 0.0  ;;  %v4152_v63 = vld [vmem:[%s6258_s6 + $0x8] sm:$0xf] }
 0x67a   :  { %v5042_v2 = vadd.f32 %v5711_v5, %v1712_v1  ;;  %v1730_v3 = vsel %vm258_vm2, %v5038_v62, 0.0  ;;  %v4157_v1 = vld [vmem:[%s6258_s6 + $0xc] sm:$0xf] }
 0x67b   :  { %v1735_v25 = vsel %vm258_vm2, %v5040_v0, 0.0 }
 0x67c   :  { %v1731_v20 = vsel %vm258_vm2, %v5042_v2, 0.0 }
 0x67d   :  { %v1732_v21 = vadd.f32 %v1731_v20, %v1730_v3  ;;  %v4167_v3 = vld [vmem:[%s6258_s6 + $0x14] sm:$0xf]  ;;  %v4172_v20 = vld [vmem:[%s6258_s6 + $0x18] sm:$0xf] }
 0x67f   :  { %v1734_v23 = vadd.f32 %v1733_v22, %v1732_v21  ;;  %v4177_v21 = vld [vmem:[%s6258_s6 + $0x1c] sm:$0xf]  ;;  %v4182_v22 = vld [vmem:[%s6258_s6 + $0x20] sm:$0xf] }
 0x681   :  { %v1736_v24 = vadd.f32 %v1735_v25, %v1734_v23  ;;  %v5182_v23 = vld [vmem:[%s6259_s7 + $0x10] sm:$0xff]   ;;  %v5183_v25 = vld [vmem:[%s6259_s7 + $0x18] sm:$0xff]  }
 0x683   :  { %v1737_v27 = vrot.slane %v1736_v24, 4 }
 0x685   :  { %v1738_v29 = vadd.f32 %v1737_v27, %v1736_v24 }
 0x687   :  { %v1739_v26 = vrot.slane %v1738_v29, 2 }
 0x689   :  { %v1740_v6 = vadd.f32 %v1739_v26, %v1738_v29 }
 0x68b   :  { %v1741_v7 = vrot.slane %v1740_v6, 1 }
 0x68d   :  { %v1742_v28 = vadd.f32 %v1741_v7, %v1740_v6 }
 0x68f   :  { %v1744_v37 = vmul.f32 0.03125, %v1742_v28 }
 0x691   :  { %v1745_v38 = vsub.f32 %v5038_v62, %v1744_v37  ;;  %v1746_v5 = vsub.f32 %v5042_v2, %v1744_v37  ;;  %v1747_v8 = vsub.f32 %v5036_v60, %v1744_v37  ;;  %v1748_v9 = vsub.f32 %v5040_v0, %v1744_v37  ;;  %v1831_v62 = vld [vmem:[%s6258_s6] sm:$0xf]  ;;  %v4144_v0 = vld [vmem:[%s6258_s6 + $0x4] sm:$0xf]  ;;  %v4162_v2 = vld [vmem:[%s6258_s6 + $0x10] sm:$0xf] }
 0x693   :  { %v1749_v39 = vmul.f32 %v1745_v38, %v1745_v38  ;;  %v1750_v10 = vmul.f32 %v1746_v5, %v1746_v5  ;;  %v1751_v40 = vmul.f32 %v1747_v8, %v1747_v8  ;;  %v1752_v11 = vmul.f32 %v1748_v9, %v1748_v9 }
 0x695   :  { %v1753_v16 = vsel %vm258_vm2, %v1749_v39, 0.0  ;;  %v1754_v17 = vsel %vm258_vm2, %v1750_v10, 0.0  ;;  %v1756_v41 = vsel %vm258_vm2, %v1751_v40, 0.0  ;;  %v1758_v42 = vsel %vm258_vm2, %v1752_v11, 0.0 }
 0x696   :  { %v1755_v13 = vadd.f32 %v1754_v17, %v1753_v16 }
 0x698   :  { %v1757_v15 = vadd.f32 %v1756_v41, %v1755_v13  ;;  %v5185_v13 = vld [vmem:[%s6259_s7 + $0x8] sm:$0xff]  }
 0x69a   :  { %v1759_v12 = vadd.f32 %v1758_v42, %v1757_v15 }
 0x69c   :  { %v1760_v43 = vrot.slane %v1759_v12, 4 }
 0x69e   :  { %v1761_v14 = vadd.f32 %v1760_v43, %v1759_v12  ;;  %v5186_v43 = vld [vmem:[%s6259_s7 + $0x20] sm:$0xff]  }
 0x6a0   :  { %v1762_v44 = vrot.slane %v1761_v14, 2 }
 0x6a2   :  { %v1763_v18 = vadd.f32 %v1762_v44, %v1761_v14  ;;  %v5187_v44 = vld [vmem:[%s6259_s7 + $0x28] sm:$0xff]  }
 0x6a4   :  { %v1764_v45 = vrot.slane %v1763_v18, 1 }
 0x6a6   :  { %v1765_v19 = vadd.f32 %v1764_v45, %v1763_v18 }
 0x6a8   :  { %v1766_v46 = vmul.f32 0.03125, %v1765_v19 }
 0x6aa   :  { %v1767_v47 = vadd.f32 1e-05, %v1766_v46 }
 0x6ac   :  { %5239 = vrsqrt.f32 %v1767_v47 }
 0x6b6   :  { %v5240_v48 = vpop.eup %5239 }
 0x6b7   :  { %v1769_v50 = vmul.f32 %v5240_v48, %v1745_v38  ;;  %v1770_v51 = vmul.f32 %v5240_v48, %v1746_v5  ;;  %v1771_v52 = vmul.f32 %v5240_v48, %v1747_v8  ;;  %v1772_v53 = vmul.f32 %v5240_v48, %v1748_v9  ;;  %v5184_v5 = vld [vmem:[%s6259_s7] sm:$0xff]   ;;  %v5188_v48 = vld [vmem:[%s6259_s7 + $0x30] sm:$0xff]  }
 0x6b9   :  { %v1777_v55 = vmul.f32 %v4141_v49, %v1769_v50  ;;  %v1778_v56 = vmul.f32 %v4141_v49, %v1770_v51  ;;  %v1779_v30 = vmul.f32 %v4141_v49, %v1771_v52  ;;  %v1780_v31 = vmul.f32 %v4141_v49, %v1772_v53  ;;  %v5189_v53 = vld [vmem:[%s6259_s7 + $0x38] sm:$0xff]  }
 0x6bb   :  { %v1785_v32 = vadd.f32 %v4142_v54, %v1777_v55  ;;  %v1786_v33 = vadd.f32 %v4142_v54, %v1778_v56  ;;  %v1787_v34 = vadd.f32 %v4142_v54, %v1779_v30  ;;  %v1788_v35 = vadd.f32 %v4142_v54, %v1780_v31 }
 0x6bd   :  { %v1789_v36 = vmax.f32 %v1785_v32, 0.0  ;;  %v1790_v57 = vmax.f32 %v1786_v33, 0.0  ;;  %v1791_v58 = vmax.f32 %v1787_v34, 0.0  ;;  %v1792_v59 = vmax.f32 %v1788_v35, 0.0  ;;  %v5190_v32 = vld [vmem:[%s6259_s7 + $0x40] sm:$0xff]   ;;  %v5191_v33 = vld [vmem:[%s6259_s7 + $0x48] sm:$0xff]  }
 0x6bf   :  { %v1793_v60 = vpack.c.bf16 %v1790_v57, %v1789_v36  ;;  %v1794_v61 = vpack.c.bf16 %v1792_v59, %v1791_v58  ;;  %v5192_v59 = vld [vmem:[%s6259_s7 + $0x50] sm:$0xff]  }
 0x6c1   :  { %4766 = vmatpush3.bf16.msra.mxu0 %v1793_v60  ;;  %4798 = vmatpush3.bf16.msra.mxu1 %v1793_v60 }
 0x6c2   :  { %4767 = vmatprep.subr.bf16.mxu0 %v5249_v4  ;;  %4799 = vmatprep.subr.bf16.mxu1 %v5249_v4 }
 0x6c5   :  { %4768 = vmatpush3.bf16.msra.mxu0 %v1794_v61  ;;  %4800 = vmatpush3.bf16.msra.mxu1 %v1794_v61 }
 0x6c6   :  { %4773 = vmatprep.subr.bf16.mxu0 %v5249_v4  ;;  %4813 = vmatprep.subr.bf16.mxu1 %v5249_v4 }
 0x6c8   :  { %4770 = vmatmul.mubr.msk.bf16.vlgmr.msra.gmra.mrb[36].mxu0 %vm258_vm2, %v1831_v62  ;;  %4802 = vmatmul.mubr.msk.bf16.vlgmr.msra.gmra.mrb[28].mxu1 %vm258_vm2, %v4152_v63  ;;  %v5194_v62 = vld [vmem:[%s6259_s7 + $0x60] sm:$0xff]   ;;  %v5195_v63 = vld [vmem:[%s6259_s7 + $0x68] sm:$0xff]  }
 0x6c9   :  { %4774 = vmatpush3.bf16.msra.mxu0 %v1793_v60  ;;  %4814 = vmatpush3.bf16.msra.mxu1 %v1793_v60 }
 0x6ca   :  { %4775 = vmatprep.subr.bf16.mxu0 %v5249_v4  ;;  %4815 = vmatprep.subr.bf16.mxu1 %v5249_v4 }
 0x6cb   :  { %4777 = vmatprep.mubr.msk.bf16.mxu0 %vm5250_vm3, %v5249_v4  ;;  %4817 = vmatprep.mubr.msk.bf16.mxu1 %vm5250_vm3, %v5249_v4 }
 0x6cd   :  { %4776 = vmatpush3.bf16.msra.mxu0 %v1794_v61  ;;  %4816 = vmatpush3.bf16.msra.mxu1 %v1794_v61 }
 0x6ce   :  { %4829 = vmatprep.subr.bf16.mxu1 %v5249_v4  ;;  %4781 = vmatprep.subr.bf16.mxu0 %v5249_v4 }
 0x6d0   :  { %4778 = vmatmul.mubr.msk.bf16.vlgmr.msra.gmra.mrb[40].mxu0 %vm258_vm2, %v4144_v0  ;;  %4818 = vmatmul.mubr.msk.bf16.vlgmr.msra.gmra.mrb[32].mxu1 %vm258_vm2, %v4157_v1  ;;  %v5196_v1 = vld [vmem:[%s6259_s7 + $0x70] sm:$0xff]  }
 0x6d1   :  { %4830 = vmatpush3.bf16.msra.mxu1 %v1793_v60  ;;  %4833 = vmatprep.mubr.msk.bf16.mxu1 %vm5250_vm3, %v5249_v4 }
 0x6d2   :  { %4831 = vmatprep.subr.bf16.mxu1 %v5249_v4  ;;  %4785 = vmatprep.mubr.msk.bf16.mxu0 %vm5250_vm3, %v5249_v4 }
 0x6d3   :  { %4782 = vmatpush3.bf16.msra.mxu0 %v5182_v23 }
 0x6d4   :  { %4783 = vmatprep.subr.bf16.mxu0 %v5249_v4 }
 0x6d5   :  { %4832 = vmatpush3.bf16.msra.mxu1 %v1794_v61 }
 0x6d6   :  { %4845 = vmatprep.subr.bf16.mxu1 %v5249_v4 }
 0x6d7   :  { %4784 = vmatpush3.bf16.msra.mxu0 %v5183_v25 }
 0x6d8   :  { %4834 = vmatmul.mubr.msk.bf16.vlgmr.msra.gmra.mrb[36].mxu1 %vm258_vm2, %v4162_v2  ;;  %4789 = vmatprep.subr.bf16.mxu0 %v5249_v4  ;;  %v5197_v2 = vld [vmem:[%s6259_s7 + $0x78] sm:$0xff]  }
 0x6d9   :  { %4846 = vmatpush3.bf16.msra.mxu1 %v1793_v60  ;;  %4849 = vmatprep.mubr.msk.bf16.mxu1 %vm5250_vm3, %v5249_v4 }
 0x6da   :  { %4847 = vmatprep.subr.bf16.mxu1 %v5249_v4 }
 0x6dd   :  { %4848 = vmatpush3.bf16.msra.mxu1 %v1794_v61 }
 0x6de   :  { %4861 = vmatprep.subr.bf16.mxu1 %v5249_v4 }
 0x6e0   :  { %4850 = vmatmul.mubr.msk.bf16.vlgmr.msra.gmra.mrb[40].mxu1 %vm258_vm2, %v4167_v3 }
 0x6e1   :  { %4862 = vmatpush3.bf16.msra.mxu1 %v1793_v60  ;;  %4865 = vmatprep.mubr.msk.bf16.mxu1 %vm5250_vm3, %v5249_v4 }
 0x6e2   :  { %4863 = vmatprep.subr.bf16.mxu1 %v5249_v4 }
 0x6e5   :  { %4864 = vmatpush3.bf16.msra.mxu1 %v1794_v61 }
 0x6e6   :  { %4877 = vmatprep.subr.bf16.mxu1 %v5249_v4 }
 0x6e8   :  { %4866 = vmatmul.mubr.msk.bf16.vlgmr.msra.gmra.mrb[44].mxu1 %vm258_vm2, %v4172_v20  ;;  %v5198_v20 = vld [vmem:[%s6259_s7 + $0x80] sm:$0xff]  }
 0x6e9   :  { %4878 = vmatpush3.bf16.msra.mxu1 %v1793_v60  ;;  %4881 = vmatprep.mubr.msk.bf16.mxu1 %vm5250_vm3, %v5249_v4 }
 0x6ea   :  { %4879 = vmatprep.subr.bf16.mxu1 %v5249_v4 }
 0x6ed   :  { %4880 = vmatpush3.bf16.msra.mxu1 %v1794_v61 }
 0x6ee   :  { %4893 = vmatprep.subr.bf16.mxu1 %v5249_v4 }
 0x6f0   :  { %4882 = vmatmul.mubr.msk.bf16.vlgmr.msra.gmra.mrb[48].mxu1 %vm258_vm2, %v4177_v21  ;;  %v5199_v21 = vld [vmem:[%s6259_s7 + $0x88] sm:$0xff]  }
 0x6f1   :  { %4894 = vmatpush3.bf16.msra.mxu1 %v1793_v60  ;;  %4897 = vmatprep.mubr.msk.bf16.mxu1 %vm5250_vm3, %v5249_v4  ;;  %v5193_v60 = vld [vmem:[%s6259_s7 + $0x58] sm:$0xff]  }
 0x6f2   :  { %4895 = vmatprep.subr.bf16.mxu1 %v5249_v4 }
 0x6f5   :  { %4896 = vmatpush3.bf16.msra.mxu1 %v1794_v61 }
 0x6f6   :  { %4909 = vmatprep.subr.bf16.mxu1 %v5249_v4 }
 0x6f8   :  { %4898 = vmatmul.mubr.msk.bf16.vlgmr.msra.gmra.mrb[52].mxu1 %vm258_vm2, %v4182_v22 }
 0x6f9   :  { %4911 = vmatprep.mubr.msk.bf16.mxu1 %vm5250_vm3, %v5249_v4 }
 0x79b   :  { %v1869_v24 = vpop.f32.mrb[36].mxu0  ;;  %v2071_v27 = vpop.f32.mrb[28].mxu1 }
 0x79c   :  { %v4771_v29 = vpop.f32.mrb[37].mxu0  ;;  %v4803_v26 = vpop.f32.mrb[29].mxu1  ;;  %v1875_v14 = vpack.c.bf16 %v1869_v24, %v1869_v24  ;;  %v2077_v47 = vpack.c.bf16 %v2071_v27, %v2071_v27 }
 0x79d   :  { %v1872_v6 = vpop.f32.mrb[38].mxu0  ;;  %v2074_v7 = vpop.f32.mrb[30].mxu1 }
 0x79e   :  { %v4772_v28 = vpop.f32.mrb[39].mxu0  ;;  %v4804_v37 = vpop.f32.mrb[31].mxu1 }
 0x7a3   :  { %v1915_v38 = vpop.f32.mrb[40].mxu0  ;;  %v2173_v8 = vpop.f32.mrb[32].mxu1 }
 0x7a4   :  { %v1921_v9 = vpack.c.bf16 %v1915_v38, %v1915_v38  ;;  %v4779_v39 = vpop.f32.mrb[41].mxu0  ;;  %v4819_v10 = vpop.f32.mrb[33].mxu1  ;;  %v2179_v30 = vpack.c.bf16 %v2173_v8, %v2173_v8 }
 0x7a5   :  { %v1918_v40 = vpop.f32.mrb[42].mxu0  ;;  %v2176_v11 = vpop.f32.mrb[34].mxu1 }
 0x7a6   :  { %v4780_v16 = vpop.f32.mrb[43].mxu0  ;;  %4786 = vmatmul.mubr.msk.bf16.vlgmr.msra.gmra.mrb[44].mxu0 %vm258_vm2, %v1921_v9  ;;  %v4820_v17 = vpop.f32.mrb[35].mxu1 }
 0x7a7   :  { %4790 = vmatpush3.bf16.msra.mxu0 %v5184_v5  ;;  %4793 = vmatprep.mubr.msk.bf16.mxu0 %vm5250_vm3, %v5249_v4 }
 0x7a8   :  { %4791 = vmatprep.subr.bf16.mxu0 %v5249_v4 }
 0x7ab   :  { %4792 = vmatpush3.bf16.msra.mxu0 %v5185_v13  ;;  %v2275_v41 = vpop.f32.mrb[36].mxu1 }
 0x7ac   :  { %4805 = vmatprep.subr.bf16.mxu0 %v5249_v4  ;;  %v4835_v15 = vpop.f32.mrb[37].mxu1  ;;  %v2281_v58 = vpack.c.bf16 %v2275_v41, %v2275_v41 }
 0x7ad   :  { %v2278_v42 = vpop.f32.mrb[38].mxu1 }
 0x7ae   :  { %v4836_v12 = vpop.f32.mrb[39].mxu1 }
 0x7af   :  { %v4187_v12 = vld [vmem:[%s6261_s8] ss:$0 sm:$0xff] }
 0x7b2   :  { %4794 = vmatmul.mubr.msk.bf16.vlgmr.msra.gmra.mrb[44].mxu0 %vm258_vm2, %v1875_v14  ;;  %v4188_v14 = vld [vmem:[%s6261_s8 + $0x1] ss:$0 sm:$0xff] }
 0x7b3   :  { %4806 = vmatpush3.bf16.msra.mxu0 %v5186_v43  ;;  %4809 = vmatprep.mubr.msk.bf16.mxu0 %vm5250_vm3, %v5249_v4  ;;  %v2377_v18 = vpop.f32.mrb[40].mxu1 }
 0x7b4   :  { %4807 = vmatprep.subr.bf16.mxu0 %v5249_v4  ;;  %v4851_v45 = vpop.f32.mrb[41].mxu1  ;;  %v2383_v61 = vpack.c.bf16 %v2377_v18, %v2377_v18 }
 0x7b5   :  { %v2380_v19 = vpop.f32.mrb[42].mxu1 }
 0x7b6   :  { %v4852_v46 = vpop.f32.mrb[43].mxu1 }
 0x7b7   :  { %4808 = vmatpush3.bf16.msra.mxu0 %v5187_v44 }
 0x7b8   :  { %4821 = vmatprep.subr.bf16.mxu0 %v5249_v4 }
 0x7bb   :  { %v2479_v49 = vpop.f32.mrb[44].mxu1 }
 0x7bc   :  { %v4867_v50 = vpop.f32.mrb[45].mxu1  ;;  %v2485_v0 = vpack.c.bf16 %v2479_v49, %v2479_v49  ;;  %v5200_v49 = vld [vmem:[%s6260_s10 + $0x10] sm:$0xff]  }
 0x7bd   :  { %v2482_v51 = vpop.f32.mrb[46].mxu1  ;;  %v4198_v50 = vld [vmem:[%s6262_s9 + $0x2] sm:$0x1] }
 0x7be   :  { %4810 = vmatmul.mubr.msk.bf16.vlgmr.msra.gmra.mrb[44].mxu0 %vm258_vm2, %v2077_v47  ;;  %v4868_v52 = vpop.f32.mrb[47].mxu1  ;;  %v4190_v47 = vld [vmem:[%s6262_s9 + $0x1] sm:$0x1]  ;;  %v4203_v51 = vld [vmem:[%s6262_s9 + $0x3] sm:$0x1] }
 0x7bf   :  { %4822 = vmatpush3.bf16.msra.mxu0 %v5188_v48  ;;  %4825 = vmatprep.mubr.msk.bf16.mxu0 %vm5250_vm3, %v5249_v4  ;;  %v2818_v48 = vld [vmem:[%s6262_s9] sm:$0x1]  ;;  %v4208_v52 = vld [vmem:[%s6262_s9 + $0x4] sm:$0x1] }
 0x7c0   :  { %4823 = vmatprep.subr.bf16.mxu0 %v5249_v4 }
 0x7c3   :  { %4824 = vmatpush3.bf16.msra.mxu0 %v5189_v53  ;;  %v2581_v54 = vpop.f32.mrb[48].mxu1  ;;  %v4213_v53 = vld [vmem:[%s6262_s9 + $0x5] sm:$0x1] }
 0x7c4   :  { %4837 = vmatprep.subr.bf16.mxu0 %v5249_v4  ;;  %v4883_v55 = vpop.f32.mrb[49].mxu1  ;;  %v2587_v3 = vpack.c.bf16 %v2581_v54, %v2581_v54  ;;  %v4218_v54 = vld [vmem:[%s6262_s9 + $0x6] sm:$0x1] }
 0x7c5   :  { %v2584_v56 = vpop.f32.mrb[50].mxu1  ;;  %v4223_v55 = vld [vmem:[%s6262_s9 + $0x7] sm:$0x1] }
 0x7c6   :  { %v4884_v31 = vpop.f32.mrb[51].mxu1  ;;  %v4228_v56 = vld [vmem:[%s6262_s9 + $0x8] sm:$0x1] }
 0x7ca   :  { %4826 = vmatmul.mubr.msk.bf16.vlgmr.msra.gmra.mrb[44].mxu0 %vm258_vm2, %v2179_v30  ;;  %v5201_v30 = vld [vmem:[%s6260_s10 + $0x18] sm:$0xff]  }
 0x7cb   :  { %4838 = vmatpush3.bf16.msra.mxu0 %v5190_v32  ;;  %4841 = vmatprep.mubr.msk.bf16.mxu0 %vm5250_vm3, %v5249_v4  ;;  %v2683_v34 = vpop.f32.mrb[52].mxu1  ;;  %v5202_v32 = vld [vmem:[%s6260_s10] sm:$0xff]  }
 0x7cc   :  { %4839 = vmatprep.subr.bf16.mxu0 %v5249_v4  ;;  %v4899_v35 = vpop.f32.mrb[53].mxu1  ;;  %v2689_v22 = vpack.c.bf16 %v2683_v34, %v2683_v34 }
 0x7cd   :  { %v2686_v36 = vpop.f32.mrb[54].mxu1 }
 0x7ce   :  { %v4900_v57 = vpop.f32.mrb[55].mxu1 }
 0x7cf   :  { %4840 = vmatpush3.bf16.msra.mxu0 %v5191_v33 }
 0x7d0   :  { %4853 = vmatprep.subr.bf16.mxu0 %v5249_v4 }
 0x7d6   :  { %4842 = vmatmul.mubr.msk.bf16.vlgmr.msra.gmra.mrb[44].mxu0 %vm258_vm2, %v2281_v58 }
 0x7d7   :  { %4854 = vmatpush3.bf16.msra.mxu0 %v5192_v59  ;;  %4857 = vmatprep.mubr.msk.bf16.mxu0 %vm5250_vm3, %v5249_v4 }
 0x7d8   :  { %4855 = vmatprep.subr.bf16.mxu0 %v5249_v4 }
 0x7db   :  { %4856 = vmatpush3.bf16.msra.mxu0 %v5193_v60 }
 0x7dc   :  { %4869 = vmatprep.subr.bf16.mxu0 %v5249_v4 }
 0x7e2   :  { %4858 = vmatmul.mubr.msk.bf16.vlgmr.msra.gmra.mrb[44].mxu0 %vm258_vm2, %v2383_v61  ;;  %v5203_v61 = vld [vmem:[%s6260_s10 + $0x8] sm:$0xff]  }
 0x7e3   :  { %4870 = vmatpush3.bf16.msra.mxu0 %v5194_v62  ;;  %4873 = vmatprep.mubr.msk.bf16.mxu0 %vm5250_vm3, %v5249_v4 }
 0x7e4   :  { %4871 = vmatprep.subr.bf16.mxu0 %v5249_v4 }
 0x7e7   :  { %4872 = vmatpush3.bf16.msra.mxu0 %v5195_v63 }
 0x7e8   :  { %4885 = vmatprep.subr.bf16.mxu0 %v5249_v4 }
 0x7ee   :  { %4874 = vmatmul.mubr.msk.bf16.vlgmr.msra.gmra.mrb[44].mxu0 %vm258_vm2, %v2485_v0 }
 0x7ef   :  { %4886 = vmatpush3.bf16.msra.mxu0 %v5196_v1  ;;  %4889 = vmatprep.mubr.msk.bf16.mxu0 %vm5250_vm3, %v5249_v4 }
 0x7f0   :  { %4887 = vmatprep.subr.bf16.mxu0 %v5249_v4 }
 0x7f3   :  { %4888 = vmatpush3.bf16.msra.mxu0 %v5197_v2 }
 0x7f4   :  { %4901 = vmatprep.subr.bf16.mxu0 %v5249_v4 }
 0x7fa   :  { %4890 = vmatmul.mubr.msk.bf16.vlgmr.msra.gmra.mrb[44].mxu0 %vm258_vm2, %v2587_v3  ;;  %v5204_v3 = vld [vmem:[%s6260_s10 + $0x20] sm:$0xff]  }
 0x7fb   :  { %4902 = vmatpush3.bf16.msra.mxu0 %v5198_v20  ;;  %4905 = vmatprep.mubr.msk.bf16.mxu0 %vm5250_vm3, %v5249_v4  ;;  %v5205_v20 = vld [vmem:[%s6260_s10 + $0x28] sm:$0xff]  }
 0x7fc   :  { %4903 = vmatprep.subr.bf16.mxu0 %v5249_v4 }
 0x7ff   :  { %4904 = vmatpush3.bf16.msra.mxu0 %v5199_v21 }
 0x800   :  { %4915 = vmatprep.subr.bf16.mxu0 %v5249_v4 }
 0x806   :  { %4906 = vmatmul.mubr.msk.bf16.vlgmr.msra.gmra.mrb[44].mxu0 %vm258_vm2, %v2689_v22 }
 0x807   :  { %4917 = vmatprep.mubr.msk.bf16.mxu0 %vm5250_vm3, %v5249_v4 }
 0x8d9   :  { %v2739_v23 = vpop.f32.mrb[44].mxu0 }
 0x8da   :  { %v2748_v25 = vsel %vm258_vm2, %v2739_v23, 0.0  ;;  %v4907_v24 = vpop.f32.mrb[45].mxu0 }
 0x8db   :  { %v2749_v27 = vrot.slane %v2748_v25, 4  ;;  %v2742_v29 = vpop.f32.mrb[46].mxu0 }
 0x8dc   :  { %v4908_v26 = vpop.f32.mrb[47].mxu0 }
 0x8dd   :  { %v2750_v6 = vadd.f32 %v2749_v27, %v2748_v25  ;;  %v5206_v27 = vld [vmem:[%s6260_s10 + $0x30] sm:$0xff]  }
 0x8df   :  { %v2751_v7 = vrot.slane %v2750_v6, 2 }
 0x8e1   :  { %v2752_v28 = vadd.f32 %v2751_v7, %v2750_v6 }
 0x8e3   :  { %v2753_v37 = vrot.slane %v2752_v28, 1 }
 0x8e5   :  { %v2754_v38 = vadd.f32 %v2753_v37, %v2752_v28  ;;  %v5207_v28 = vld [vmem:[%s6260_s10 + $0x38] sm:$0xff]  }
 0x8e7   :  { %v2756_v5 = vmul.f32 0.125, %v2754_v38 }
 0x8e9   :  { %v2757_v8 = vsub.f32 %v2739_v23, %v2756_v5 }
 0x8eb   :  { %v2758_v9 = vmul.f32 %v2757_v8, %v2757_v8 }
 0x8ed   :  { %v2759_v39 = vsel %vm258_vm2, %v2758_v9, 0.0 }
 0x8ee   :  { %v2760_v10 = vrot.slane %v2759_v39, 4 }
 0x8f0   :  { %v2761_v40 = vadd.f32 %v2760_v10, %v2759_v39  ;;  %v5208_v39 = vld [vmem:[%s6260_s10 + $0x40] sm:$0xff]   ;;  %v5209_v10 = vld [vmem:[%s6260_s10 + $0x48] sm:$0xff]  }
 0x8f2   :  { %v2762_v11 = vrot.slane %v2761_v40, 2 }
 0x8f4   :  { %v2763_v16 = vadd.f32 %v2762_v11, %v2761_v40 }
 0x8f6   :  { %v2764_v17 = vrot.slane %v2763_v16, 1 }
 0x8f8   :  { %v2765_v13 = vadd.f32 %v2764_v17, %v2763_v16 }
 0x8fa   :  { %v2766_v41 = vmul.f32 0.125, %v2765_v13 }
 0x8fc   :  { %v2767_v15 = vadd.f32 1e-05, %v2766_v41  ;;  %v5210_v41 = vld [vmem:[%s6260_s10 + $0x50] sm:$0xff]  }
 0x8fe   :  { %5241 = vrsqrt.f32 %v2767_v15 }
 0x908   :  { %v5242_v42 = vpop.eup %5241 }
 0x909   :  { %v2769_v43 = vmul.f32 %v5242_v42, %v2757_v8 }
 0x90b   :  { %v2774_v44 = vmul.f32 %v4187_v12, %v2769_v43 }
 0x90d   :  { %v2779_v18 = vadd.f32 %v4188_v14, %v2774_v44  ;;  %v5211_v14 = vld [vmem:[%s6260_s10 + $0x58] sm:$0xff]  }
 0x90f   :  { %v2780_v45 = vmax.f32 %v2779_v18, 0.0 }
 0x911   :  { %v2781_v19 = vpack.c.bf16 %v2780_v45, %v2780_v45 }
 0x913   :  { %v2824_v46 = vsel %vm155_vm1, %v2781_v19, 0 }
 0x914   :  { %4910 = vmatpush3.bf16.msra.mxu1 %v2824_v46  ;;  %4916 = vmatpush3.bf16.msra.mxu0 %v2824_v46 }
 0x915   :  { %4937 = vmatprep.subr.bf16.mxu0 %v5249_v4  ;;  %4921 = vmatprep.subr.bf16.mxu1 %v5249_v4 }
 0x917   :  { %4918 = vmatmul.mubr.msk.bf16.vlgmr.msra.gmra.mrb[48].mxu0 %vm2819_vm4, %v4190_v47  ;;  %4912 = vmatmul.mubr.msk.bf16.vlgmr.msra.gmra.mrb[56].mxu1 %vm2819_vm4, %v2818_v48  ;;  %v5212_v47 = vld [vmem:[%s6260_s10 + $0x60] sm:$0xff]   ;;  %v5213_v48 = vld [vmem:[%s6260_s10 + $0x68] sm:$0xff]  }
 0x918   :  { %4938 = vmatpush3.bf16.msra.mxu0 %v2824_v46  ;;  %4939 = vmatprep.mubr.msk.bf16.mxu0 %vm5250_vm3, %v5249_v4 }
 0x919   :  { %4951 = vmatprep.subr.bf16.mxu0 %v5249_v4  ;;  %4922 = vmatpush3.bf16.msra.mxu1 %v5200_v49 }
 0x91a   :  { %4923 = vmatprep.subr.bf16.mxu1 %v5249_v4  ;;  %4925 = vmatprep.mubr.msk.bf16.mxu1 %vm5250_vm3, %v5249_v4 }
 0x91d   :  { %4924 = vmatpush3.bf16.msra.mxu1 %v5201_v30  ;;  %v5218_v30 = vld [vmem:[%s6263_s12] ss:$8 sps:$4 sm:$0xff]  }
 0x91e   :  { %4929 = vmatprep.subr.bf16.mxu1 %v5249_v4 }
 0x91f   :  { %4940 = vmatmul.mubr.msk.bf16.vlgmr.msra.gmra.mrb[52].mxu0 %vm2819_vm4, %v4198_v50  ;;  %v5214_v50 = vld [vmem:[%s6260_s10 + $0x70] sm:$0xff]  }
 0x920   :  { %4952 = vmatpush3.bf16.msra.mxu0 %v2824_v46  ;;  %4953 = vmatprep.mubr.msk.bf16.mxu0 %vm5250_vm3, %v5249_v4 }
 0x921   :  { %4965 = vmatprep.subr.bf16.mxu0 %v5249_v4 }
 0x927   :  { %4954 = vmatmul.mubr.msk.bf16.vlgmr.msra.gmra.mrb[56].mxu0 %vm2819_vm4, %v4203_v51  ;;  %v5215_v51 = vld [vmem:[%s6260_s10 + $0x78] sm:$0xff]  }
 0x928   :  { %4966 = vmatpush3.bf16.msra.mxu0 %v2824_v46  ;;  %4967 = vmatprep.mubr.msk.bf16.mxu0 %vm5250_vm3, %v5249_v4 }
 0x929   :  { %4979 = vmatprep.subr.bf16.mxu0 %v5249_v4 }
 0x92f   :  { %4968 = vmatmul.mubr.msk.bf16.vlgmr.msra.gmra.mrb[60].mxu0 %vm2819_vm4, %v4208_v52 }
 0x930   :  { %4980 = vmatpush3.bf16.msra.mxu0 %v2824_v46  ;;  %4981 = vmatprep.mubr.msk.bf16.mxu0 %vm5250_vm3, %v5249_v4 }
 0x931   :  { %4993 = vmatprep.subr.bf16.mxu0 %v5249_v4 }
 0x937   :  { %4982 = vmatmul.mubr.msk.bf16.vlgmr.msra.gmra.mrb[64].mxu0 %vm2819_vm4, %v4213_v53  ;;  %v5216_v53 = vld [vmem:[%s6260_s10 + $0x80] sm:$0xff]  }
 0x938   :  { %4994 = vmatpush3.bf16.msra.mxu0 %v2824_v46  ;;  %4995 = vmatprep.mubr.msk.bf16.mxu0 %vm5250_vm3, %v5249_v4 }
 0x939   :  { %5007 = vmatprep.subr.bf16.mxu0 %v5249_v4 }
 0x93f   :  { %4996 = vmatmul.mubr.msk.bf16.vlgmr.msra.gmra.mrb[68].mxu0 %vm2819_vm4, %v4218_v54  ;;  %v5217_v54 = vld [vmem:[%s6260_s10 + $0x88] sm:$0xff]  }
 0x940   :  { %5008 = vmatpush3.bf16.msra.mxu0 %v2824_v46  ;;  %5009 = vmatprep.mubr.msk.bf16.mxu0 %vm5250_vm3, %v5249_v4 }
 0x941   :  { %5021 = vmatprep.subr.bf16.mxu0 %v5249_v4 }
 0x947   :  { %5010 = vmatmul.mubr.msk.bf16.vlgmr.msra.gmra.mrb[72].mxu0 %vm2819_vm4, %v4223_v55 }
 0x948   :  { %5022 = vmatpush3.bf16.msra.mxu0 %v2824_v46  ;;  %5023 = vmatprep.mubr.msk.bf16.mxu0 %vm5250_vm3, %v5249_v4 }
 0x94f   :  { %5024 = vmatmul.mubr.msk.bf16.vlgmr.msra.gmra.mrb[76].mxu0 %vm2819_vm4, %v4228_v56  ;;  %v5220_v56 = vld [vmem:[%s6263_s12 + $0x4] ss:$8 sps:$4 sm:$0xff]  }
 0x950   :  { %3813 = vmatprep.subr.bf16.mxu0 %v5220_v56 }
 0x951   :  { %3814 = vmatpush1.bf16.msra.mxu0 %v5218_v30 }
 0x9ea   :  { %v2906_v31 = vpop.f32.mrb[48].mxu0  ;;  %v2860_v33 = vpop.f32.mrb[56].mxu1 }
 0x9eb   :  { %v2912_v34 = vpack.c.bf16 %v2906_v31, %v2906_v31  ;;  %v4919_v35 = vpop.f32.mrb[49].mxu0  ;;  %v4913_v36 = vpop.f32.mrb[57].mxu1  ;;  %v2866_v1 = vpack.c.bf16 %v2860_v33, %v2860_v33  ;;  %v5223_v31 = vld [vmem:[%s6263_s12 + $0x14] ss:$8 sps:$4 sm:$0xff]  }
 0x9ec   :  { %v2909_v57 = vpop.f32.mrb[50].mxu0  ;;  %v2863_v58 = vpop.f32.mrb[58].mxu1  ;;  %3815 = vmatprep.subr.bf16.mxu0 %v5223_v31 }
 0x9ed   :  { %4926 = vmatmul.mubr.msk.bf16.vlgmr.msra.gmra.mrb[60].mxu1 %vm258_vm2, %v2912_v34  ;;  %v4920_v59 = vpop.f32.mrb[51].mxu0  ;;  %v4914_v60 = vpop.f32.mrb[59].mxu1 }
 0x9ee   :  { %4930 = vmatpush3.bf16.msra.mxu1 %v5202_v32  ;;  %4933 = vmatprep.mubr.msk.bf16.mxu1 %vm5250_vm3, %v5249_v4  ;;  %v5251_v32 = vmov 0  }
 0x9ef   :  { %4931 = vmatprep.subr.bf16.mxu1 %v5249_v4  ;;  %3845 = vmatprep.mubr.bf16.mxu0 %v5251_v32 }
 0x9f2   :  { %4932 = vmatpush3.bf16.msra.mxu1 %v5203_v61  ;;  %v3062_v62 = vpop.f32.mrb[52].mxu0 }
 0x9f3   :  { %4943 = vmatprep.subr.bf16.mxu1 %v5249_v4  ;;  %v4941_v63 = vpop.f32.mrb[53].mxu0  ;;  %v3068_v24 = vpack.c.bf16 %v3062_v62, %v3062_v62 }
 0x9f4   :  { %v3065_v0 = vpop.f32.mrb[54].mxu0 }
 0x9f5   :  { %v4942_v2 = vpop.f32.mrb[55].mxu0 }
 0x9f9   :  { %4934 = vmatmul.mubr.msk.bf16.vlgmr.msra.gmra.mrb[60].mxu1 %vm258_vm2, %v2866_v1 }
 0x9fa   :  { %4944 = vmatpush3.bf16.msra.mxu1 %v5204_v3  ;;  %4947 = vmatprep.mubr.msk.bf16.mxu1 %vm5250_vm3, %v5249_v4  ;;  %v3164_v21 = vpop.f32.mrb[56].mxu0 }
 0x9fb   :  { %4945 = vmatprep.subr.bf16.mxu1 %v5249_v4  ;;  %v4955_v22 = vpop.f32.mrb[57].mxu0  ;;  %v3170_v8 = vpack.c.bf16 %v3164_v21, %v3164_v21 }
 0x9fc   :  { %v3167_v23 = vpop.f32.mrb[58].mxu0 }
 0x9fd   :  { %v4956_v25 = vpop.f32.mrb[59].mxu0 }
 0x9fe   :  { %4946 = vmatpush3.bf16.msra.mxu1 %v5205_v20 }
 0x9ff   :  { %4957 = vmatprep.subr.bf16.mxu1 %v5249_v4 }
 0xa02   :  { %v3266_v29 = vpop.f32.mrb[60].mxu0 }
 0xa03   :  { %v4969_v26 = vpop.f32.mrb[61].mxu0  ;;  %v3272_v13 = vpack.c.bf16 %v3266_v29, %v3266_v29 }
 0xa04   :  { %v3269_v6 = vpop.f32.mrb[62].mxu0 }
 0xa05   :  { %4948 = vmatmul.mubr.msk.bf16.vlgmr.msra.gmra.mrb[60].mxu1 %vm258_vm2, %v3068_v24  ;;  %v4970_v7 = vpop.f32.mrb[63].mxu0  ;;  %v4233_v6 = vld [vmem:[%s6265_s11] ss:$0 sm:$0xff] }
 0xa06   :  { %4958 = vmatpush3.bf16.msra.mxu1 %v5206_v27  ;;  %4961 = vmatprep.mubr.msk.bf16.mxu1 %vm5250_vm3, %v5249_v4 }
 0xa07   :  { %4959 = vmatprep.subr.bf16.mxu1 %v5249_v4 }
 0xa0a   :  { %4960 = vmatpush3.bf16.msra.mxu1 %v5207_v28  ;;  %v3368_v37 = vpop.f32.mrb[64].mxu0  ;;  %v4234_v28 = vld [vmem:[%s6265_s11 + $0x1] ss:$0 sm:$0xff] }
 0xa0b   :  { %4971 = vmatprep.subr.bf16.mxu1 %v5249_v4  ;;  %v4983_v38 = vpop.f32.mrb[65].mxu0  ;;  %v3374_v19 = vpack.c.bf16 %v3368_v37, %v3368_v37 }
 0xa0c   :  { %v3371_v5 = vpop.f32.mrb[66].mxu0 }
 0xa0d   :  { %v4984_v9 = vpop.f32.mrb[67].mxu0 }
 0xa11   :  { %4962 = vmatmul.mubr.msk.bf16.vlgmr.msra.gmra.mrb[60].mxu1 %vm258_vm2, %v3170_v8  ;;  %v5224_v8 = vld [vmem:[%s6264_s14] sm:$0xff]  }
 0xa12   :  { %4972 = vmatpush3.bf16.msra.mxu1 %v5208_v39  ;;  %4975 = vmatprep.mubr.msk.bf16.mxu1 %vm5250_vm3, %v5249_v4  ;;  %v3470_v40 = vpop.f32.mrb[68].mxu0  ;;  %v5225_v39 = vld [vmem:[%s6264_s14 + $0x8] sm:$0xff]  }
 0xa13   :  { %4973 = vmatprep.subr.bf16.mxu1 %v5249_v4  ;;  %v4997_v11 = vpop.f32.mrb[69].mxu0  ;;  %v3476_v49 = vpack.c.bf16 %v3470_v40, %v3470_v40  ;;  %v5227_v40 = vld [vmem:[%s6264_s14 + $0x18] sm:$0xff]  }
 0xa14   :  { %v3473_v16 = vpop.f32.mrb[70].mxu0  ;;  %v5228_v11 = vld [vmem:[%s6264_s14 + $0x20] sm:$0xff]  }
 0xa15   :  { %v4998_v17 = vpop.f32.mrb[71].mxu0  ;;  %v5229_v16 = vld [vmem:[%s6264_s14 + $0x28] sm:$0xff]  }
 0xa16   :  { %4974 = vmatpush3.bf16.msra.mxu1 %v5209_v10  ;;  %v5226_v10 = vld [vmem:[%s6264_s14 + $0x10] sm:$0xff]  }
 0xa17   :  { %4985 = vmatprep.subr.bf16.mxu1 %v5249_v4  ;;  %v5230_v17 = vld [vmem:[%s6264_s14 + $0x30] sm:$0xff]  }
 0xa1a   :  { %v3572_v15 = vpop.f32.mrb[72].mxu0 }
 0xa1b   :  { %v5011_v42 = vpop.f32.mrb[73].mxu0  ;;  %v3578_v52 = vpack.c.bf16 %v3572_v15, %v3572_v15  ;;  %v5233_v15 = vld [vmem:[%s6264_s14 + $0x48] sm:$0xff]  }
 0xa1c   :  { %v3575_v12 = vpop.f32.mrb[74].mxu0  ;;  %v5234_v42 = vld [vmem:[%s6264_s14 + $0x50] sm:$0xff]  }
 0xa1d   :  { %4976 = vmatmul.mubr.msk.bf16.vlgmr.msra.gmra.mrb[60].mxu1 %vm258_vm2, %v3272_v13  ;;  %v5012_v43 = vpop.f32.mrb[75].mxu0  ;;  %v5231_v13 = vld [vmem:[%s6264_s14 + $0x38] sm:$0xff]  }
 0xa1e   :  { %4986 = vmatpush3.bf16.msra.mxu1 %v5210_v41  ;;  %4989 = vmatprep.mubr.msk.bf16.mxu1 %vm5250_vm3, %v5249_v4  ;;  %v5232_v41 = vld [vmem:[%s6264_s14 + $0x40] sm:$0xff]   ;;  %v5235_v12 = vld [vmem:[%s6264_s14 + $0x58] sm:$0xff]  }
 0xa1f   :  { %4987 = vmatprep.subr.bf16.mxu1 %v5249_v4  ;;  %v5236_v43 = vld [vmem:[%s6264_s14 + $0x60] ss:$0 sps:$4 sm:$0xff]  }
 0xa22   :  { %4988 = vmatpush3.bf16.msra.mxu1 %v5211_v14  ;;  %v3674_v44 = vpop.f32.mrb[76].mxu0  ;;  %v3970_v14 = vsel %vm155_vm1, %v5236_v43, 0 }
 0xa23   :  { %4999 = vmatprep.subr.bf16.mxu1 %v5249_v4  ;;  %v5025_v18 = vpop.f32.mrb[77].mxu0  ;;  %v3680_v55 = vpack.c.bf16 %v3674_v44, %v3674_v44  ;;  %v3780_v44 = vlaneseq }
 0xa24   :  { %v3677_v45 = vpop.f32.mrb[78].mxu0 }
 0xa25   :  { %v5026_v46 = vpop.f32.mrb[79].mxu0  ;;  %v3781_v18 = vshrl.u32 %v3780_v44, 7 }
 0xa27   :  { %v3782_v45 = vsub.s32 0, %v3781_v18  ;;  %v3786_v46 = vsub.s32 1, %v3781_v18 }
 0xa29   :  { %4990 = vmatmul.mubr.msk.bf16.vlgmr.msra.gmra.mrb[60].mxu1 %vm258_vm2, %v3374_v19  ;;  %v3778_v19 = vld [vmem:[%s6266_s13] sm:$0x3] }
 0xa2a   :  { %5000 = vmatpush3.bf16.msra.mxu1 %v5212_v47  ;;  %5003 = vmatprep.mubr.msk.bf16.mxu1 %vm5250_vm3, %v5249_v4  ;;  %v3783_v47 = vrot.slane %v3778_v19, %v3782_v45 }
 0xa2b   :  { %5001 = vmatprep.subr.bf16.mxu1 %v5249_v4 }
 0xa2e   :  { %5002 = vmatpush3.bf16.msra.mxu1 %v5213_v48  ;;  %v3787_v48 = vrot.slane %v3778_v19, %v3786_v46 }
 0xa2f   :  { %5013 = vmatprep.subr.bf16.mxu1 %v5249_v4 }
 0xa35   :  { %5004 = vmatmul.mubr.msk.bf16.vlgmr.msra.gmra.mrb[60].mxu1 %vm258_vm2, %v3476_v49 }
 0xa36   :  { %5014 = vmatpush3.bf16.msra.mxu1 %v5214_v50  ;;  %5017 = vmatprep.mubr.msk.bf16.mxu1 %vm5250_vm3, %v5249_v4 }
 0xa37   :  { %5015 = vmatprep.subr.bf16.mxu1 %v5249_v4 }
 0xa3a   :  { %5016 = vmatpush3.bf16.msra.mxu1 %v5215_v51 }
 0xa3b   :  { %5027 = vmatprep.subr.bf16.mxu1 %v5249_v4 }
 0xa41   :  { %5018 = vmatmul.mubr.msk.bf16.vlgmr.msra.gmra.mrb[60].mxu1 %vm258_vm2, %v3578_v52 }
 0xa42   :  { %5028 = vmatpush3.bf16.msra.mxu1 %v5216_v53  ;;  %5031 = vmatprep.mubr.msk.bf16.mxu1 %vm5250_vm3, %v5249_v4 }
 0xa43   :  { %5029 = vmatprep.subr.bf16.mxu1 %v5249_v4  ;;  %v5221_v4 = vld [vmem:[%s6263_s12 + $0x10] ss:$8 sps:$4 sm:$0xff]  }
 0xa44   :  { %3816 = vmatpush1.bf16.msra.mxu0 %v5221_v4  ;;  %v4013_v4 = vand.u32 127, %v3780_v44 }
 0xa45   :  { %3972 = vmatprep.subr.bf16.mxu0 %v5251_v32 }
 0xa46   :  { %5030 = vmatpush3.bf16.msra.mxu1 %v5217_v54  ;;  %vm4014_vm7 = vcmp.lt.s32.totalorder %v4013_v4, 6 }
 0xa4d   :  { %5032 = vmatmul.mubr.msk.bf16.vlgmr.msra.gmra.mrb[60].mxu1 %vm258_vm2, %v3680_v55 }
 0xb20   :  { %v3730_v33 = vpop.f32.mrb[60].mxu1 }
 0xb21   :  { %v3740_v34 = vsel %vm3739_vm5, %v3730_v33, 0.0  ;;  %v5033_v35 = vpop.f32.mrb[61].mxu1 }
 0xb22   :  { %v3741_v36 = vrot.slane %v3740_v34, 4  ;;  %v3733_v57 = vpop.f32.mrb[62].mxu1 }
 0xb23   :  { %v5034_v58 = vpop.f32.mrb[63].mxu1 }
 0xb24   :  { %v3742_v59 = vadd.f32 %v3741_v36, %v3740_v34 }
 0xb26   :  { %v3743_v60 = vrot.slane %v3742_v59, 2 }
 0xb28   :  { %v3744_v61 = vadd.f32 %v3743_v60, %v3742_v59 }
 0xb2a   :  { %v3745_v62 = vrot.slane %v3744_v61, 1 }
 0xb2c   :  { %v3746_v63 = vadd.f32 %v3745_v62, %v3744_v61 }
 0xb2e   :  { %v3748_v0 = vmul.f32 0.5, %v3746_v63 }
 0xb30   :  { %v3749_v1 = vsub.f32 %v3730_v33, %v3748_v0 }
 0xb32   :  { %v3750_v2 = vmul.f32 %v3749_v1, %v3749_v1 }
 0xb34   :  { %v3751_v3 = vsel %vm3739_vm5, %v3750_v2, 0.0 }
 0xb35   :  { %v3752_v20 = vrot.slane %v3751_v3, 4 }
 0xb37   :  { %v3753_v21 = vadd.f32 %v3752_v20, %v3751_v3 }
 0xb39   :  { %v3754_v22 = vrot.slane %v3753_v21, 2 }
 0xb3b   :  { %v3755_v23 = vadd.f32 %v3754_v22, %v3753_v21 }
 0xb3d   :  { %v3756_v25 = vrot.slane %v3755_v23, 1 }
 0xb3f   :  { %v3757_v24 = vadd.f32 %v3756_v25, %v3755_v23 }
 0xb41   :  { %v3758_v27 = vmul.f32 0.5, %v3757_v24 }
 0xb43   :  { %v3759_v29 = vadd.f32 1e-05, %v3758_v27 }
 0xb45   :  { %5243 = vrsqrt.f32 %v3759_v29 }
 0xb4f   :  { %v5244_v26 = vpop.eup %5243 }
 0xb50   :  { %v3761_v7 = vmul.f32 %v5244_v26, %v3749_v1 }
 0xb52   :  { %v3766_v37 = vmul.f32 %v4233_v6, %v3761_v7 }
 0xb54   :  { %v3771_v38 = vadd.f32 %v4234_v28, %v3766_v37 }
 0xb56   :  { %v3772_v5 = vmax.f32 %v3771_v38, 0.0 }
 0xb58   :  { %v3773_v9 = vpack.c.bf16 %v3772_v5, %v3772_v5 }
 0xb5a   :  { %4239 = vmatmul.mubr.msk.bf16.vlgmr.msra.gmra.mrb[80].mxu0 %vm258_vm2, %v3773_v9 }
 0xb5b   :  { %3973 = vmatpush1.bf16.msra.mxu0 %v5224_v8 }
 0xb5c   :  { %3974 = vmatprep.subr.bf16.mxu0 %v5251_v32 }
 0xb5f   :  { %3975 = vmatpush1.bf16.msra.mxu0 %v5225_v39 }
 0xb60   :  { %3976 = vmatprep.subr.bf16.mxu0 %v5251_v32 }
 0xb63   :  { %3977 = vmatpush1.bf16.msra.mxu0 %v5226_v10 }
 0xb64   :  { %3978 = vmatprep.subr.bf16.mxu0 %v5251_v32 }
 0xb67   :  { %3979 = vmatpush1.bf16.msra.mxu0 %v5227_v40 }
 0xb68   :  { %3980 = vmatprep.subr.bf16.mxu0 %v5251_v32 }
 0xb6b   :  { %3981 = vmatpush1.bf16.msra.mxu0 %v5228_v11 }
 0xb6c   :  { %3982 = vmatprep.subr.bf16.mxu0 %v5251_v32 }
 0xb6f   :  { %3983 = vmatpush1.bf16.msra.mxu0 %v5229_v16 }
 0xb70   :  { %3984 = vmatprep.subr.bf16.mxu0 %v5251_v32 }
 0xb73   :  { %3985 = vmatpush1.bf16.msra.mxu0 %v5230_v17 }
 0xb74   :  { %3986 = vmatprep.subr.bf16.mxu0 %v5251_v32 }
 0xb77   :  { %3987 = vmatpush1.bf16.msra.mxu0 %v5231_v13 }
 0xb78   :  { %3988 = vmatprep.subr.bf16.mxu0 %v5251_v32 }
 0xb7b   :  { %3989 = vmatpush1.bf16.msra.mxu0 %v5232_v41 }
 0xb7c   :  { %3990 = vmatprep.subr.bf16.mxu0 %v5251_v32 }
 0xb7f   :  { %3991 = vmatpush1.bf16.msra.mxu0 %v5233_v15 }
 0xb80   :  { %3992 = vmatprep.subr.bf16.mxu0 %v5251_v32 }
 0xb83   :  { %3993 = vmatpush1.bf16.msra.mxu0 %v5234_v42 }
 0xb84   :  { %3994 = vmatprep.subr.bf16.mxu0 %v5251_v32 }
 0xb87   :  { %3995 = vmatpush1.bf16.msra.mxu0 %v5235_v12 }
 0xb88   :  { %3996 = vmatprep.subr.bf16.mxu0 %v5251_v32  ;;  %v4240_v32 = vld [vmem:[%s6267_s15] ss:$0 sm:$0xff] }
 0xb8b   :  { %3997 = vmatpush1.bf16.msra.mxu0 %v3970_v14 }
 0xc2d   :  { %v3847_v49 = vpop.f32.mrb[80].mxu0 }
 0xc2e   :  { %v3848_v50 = vadd.f32 %v3847_v49, %v3783_v47  ;;  %v3849_v51 = vpop.f32.mrb[81].mxu0 }
 0xc2f   :  { %v3850_v52 = vadd.f32 %v3849_v51, %v3787_v48  ;;  %v3851_v53 = vpop.f32.mrb[82].mxu0 }
 0xc30   :  { %v3854_v54 = vmax.f32 %v3848_v50, 0.0  ;;  %v3852_v55 = vpop.f32.mrb[83].mxu0 }
 0xc31   :  { %v3855_v56 = vmax.f32 %v3850_v52, 0.0 }
 0xc32   :  { %v3856_v31 = vpack.c.bf16 %v3854_v54, %v3854_v54 }
 0xc33   :  { %v3857_v30 = vpack.c.bf16 %v3855_v56, %v3855_v56 }
 0xc35   :  { %4254 = vmatprep.mubr.msk.bf16.mxu0 %vm3965_vm6, %v3857_v30 }
 0xc36   :  { %4005 = vmatmul.mubr.bf16.vlgmr.msra.gmra.mrb[84].mxu0 %v3856_v31 }
 0xd09   :  { %v4006_v33 = vpop.f32.mrb[84].mxu0 }
 0xd0a   :  { %v4007_v34 = vadd.f32 %v4240_v32, %v4006_v33  ;;  %v4008_v35 = vpop.f32.mrb[85].mxu0 }
 0xd0b   :  { %v4009_v36 = vpop.f32.mrb[86].mxu0 }
 0xd0c   :  { %v4010_v57 = vpop.f32.mrb[87].mxu0  ;;  %v4015_v58 = vsel %vm4014_vm7, %v4007_v34, -1e+30 }
 0xd0d   :  { %v4017_v59 = vsel %vm4016_vm8, %v4015_v58, -inf }
 0xd0e   :  { %4018 = vmax.xlane.f32.xlu0 %v4017_v59 }
 0xd9b   :  { %v4019_v60 = vpop.xlane.xlu0 %4018 }
 0xd9c   :  { %v4020_v61 = vsub.f32 %v4015_v58, %v4019_v60 }
 0xd9e   :  { %v4021_v62 = vmul.f32 1.442695, %v4020_v61 }
 0xda0   :  { %5245 = vpow2.f32 %v4021_v62 }
 0xdaa   :  { %v5246_v63 = vpop.eup %5245 }
 0xdab   :  { %v4023_v0 = vsel %vm4016_vm8, %v5246_v63, 0.0 }
 0xdac   :  { %4024 = vadd.xlane.f32.xlu0 %v4023_v0 }
 0xe39   :  { %v4025_v1 = vpop.xlane.xlu0 %4024 }
 0xe3a   :  { %5247 = vrcp.f32 %v4025_v1 }
 0xe44   :  { %v5248_v2 = vpop.eup %5247 }
 0xe45   :  { %v4027_v3 = vmul.f32 %v5248_v2, %v5246_v63 }
 0xe47   :  { %v4028_v20 = vsel %vm4014_vm7, %v4027_v3, %v4007_v34 }
 0xe48   :  { %4029 = vst [vmem:[%s6268_s16] sm:$0x3] %v4028_v20 }

</bundles_post_ra>
